<compile_context>
chip_gen: v5e
topology: v5e:2x2
jax: 0.10.0
libtpu: 0.0.40
codegen_flags: <defaults>
</compile_context>

<pallas_src>
import jax
import jax.numpy as jnp
from jax import lax
from jax.experimental import pallas as pl
from jax.experimental.pallas import tpu as pltpu

# Small, module-consistent hyper-params (hidden scaled down to 32 for the demo)
INPUT_SIZE = 14
HIDDEN_SIZE = 32        # 4*H = 128 -> gate matrices are lane-aligned
NUM_LAYERS = 2
OUTPUT_SIZE = 1
BATCH = 2
SEQ_LEN = 8

# TPU-friendly padded sizes (zero padding; real rows/cols unaffected)
B_PAD = 8               # sublane multiple
I_PAD = 16              # input feature dim padded to a sublane multiple
O_PAD = 128             # lane-dense output columns
GH = 4 * HIDDEN_SIZE    # 128


def lstm_kernel(x2d_ref, wih0_ref, whh0_ref, b0_ref, wih1_ref, whh1_ref,
                b1_ref, wfc_ref, bfc_ref, out_ref, xproj_ref):
    """Whole forward in one kernel: time recurrence over both LSTM layers,
    then fc + sigmoid on the last hidden state of the top layer.

    MXU dots use bf16 operands + f32 accumulation; gate/state math stays f32.
    """
    H = HIDDEN_SIZE
    B = B_PAD
    TB = x2d_ref.shape[0]
    T = TB // B

    # ---- hoisted: layer-0 input projection for ALL timesteps (one bf16 matmul,
    #      f32 accumulate) -- off the serial chain ----
    xproj_ref[...] = (jnp.dot(x2d_ref[...], wih0_ref[...],
                              preferred_element_type=jnp.float32)
                      + b0_ref[...])                        # (T*B, 4H) f32

    # ---- hoisted loop invariants (bf16 weights: 2 vregs each) ----
    whh0 = whh0_ref[...]                                    # (H, 4H) bf16
    wih1 = wih1_ref[...]                                    # (H, 4H) bf16
    whh1 = whh1_ref[...]                                    # (H, 4H) bf16
    b1b = jnp.broadcast_to(b1_ref[...], (B, 4 * H))         # (B, 4H) f32

    def cell(g, c):
        # full-tile activations: 2 EUP pushes on (B, 4H) instead of 4 per-gate
        # TODO(synk): gate-column permutation to shave slice rotates needs a
        # bundle-dump check; left in PyTorch [i,f,g,o] order for clarity.
        s = jax.nn.sigmoid(g)
        th = jnp.tanh(g)
        i = s[:, 0 * H:1 * H]
        f = s[:, 1 * H:2 * H]
        gg = th[:, 2 * H:3 * H]
        o = s[:, 3 * H:4 * H]
        c_new = f * c + i * gg
        h_new = o * jnp.tanh(c_new)
        return h_new, c_new

    def step(t, carry):
        # h0/h1 carried as bf16 (ready MXU operands); c0/c1 carried as f32.
        h0, c0, h1, c1 = carry

        # layer-1 recurrent term: depends only on LAST step's h1, so it is off
        # the h0 critical chain (overlaps with cell0's VPU/EUP work below).
        r1 = jnp.dot(h1, whh1, preferred_element_type=jnp.float32) + b1b

        # layer 0: x-projection precomputed; only the K=32 recurrent dot remains
        start = pl.multiple_of(t * B, B)
        g0 = xproj_ref[pl.ds(start, B), :] + jnp.dot(
            h0, whh0, preferred_element_type=jnp.float32)
        h0f, c0 = cell(g0, c0)
        h0 = h0f.astype(jnp.bfloat16)

        # layer 1: only the input dot (K=32) sits after cell0 on the chain
        g1 = jnp.dot(h0, wih1, preferred_element_type=jnp.float32) + r1
        h1f, c1 = cell(g1, c1)
        h1 = h1f.astype(jnp.bfloat16)
        return h0, c0, h1, c1

    zb = jnp.zeros((B, H), jnp.bfloat16)
    zf = jnp.zeros((B, H), jnp.float32)
    _, _, h1, _ = lax.fori_loop(0, T, step, (zb, zf, zb, zf), unroll=True)

    logits = jnp.dot(h1, wfc_ref[...],
                     preferred_element_type=jnp.float32) + bfc_ref[...]
    out_ref[...] = jax.nn.sigmoid(logits)


def init_params(key):
    """Deterministic init matching the PyTorch parameter shapes
    (nn.LSTM / nn.Linear uniform(-1/sqrt(H), 1/sqrt(H)))."""
    k = 1.0 / jnp.sqrt(jnp.float32(HIDDEN_SIZE))
    keys = jax.random.split(key, 10)
    u = lambda kk, shp: jax.random.uniform(kk, shp, jnp.float32, -k, k)
    return {
        "wih0": u(keys[0], (4 * HIDDEN_SIZE, INPUT_SIZE)),
        "whh0": u(keys[1], (4 * HIDDEN_SIZE, HIDDEN_SIZE)),
        "bih0": u(keys[2], (4 * HIDDEN_SIZE,)),
        "bhh0": u(keys[3], (4 * HIDDEN_SIZE,)),
        "wih1": u(keys[4], (4 * HIDDEN_SIZE, HIDDEN_SIZE)),
        "whh1": u(keys[5], (4 * HIDDEN_SIZE, HIDDEN_SIZE)),
        "bih1": u(keys[6], (4 * HIDDEN_SIZE,)),
        "bhh1": u(keys[7], (4 * HIDDEN_SIZE,)),
        "wfc":  u(keys[8], (OUTPUT_SIZE, HIDDEN_SIZE)),
        "bfc":  u(keys[9], (OUTPUT_SIZE,)),
    }


def pack_params(p):
    """ONE-TIME weight preprocessing (transpose / pad / bias fold / bf16 cast).
    Hoisted out of the per-call path per the perf review."""
    H = HIDDEN_SIZE
    I = INPUT_SIZE
    return {
        "wih0": jnp.pad(p["wih0"].T, ((0, I_PAD - I), (0, 0))
                        ).astype(jnp.bfloat16),                  # (I_PAD, 4H)
        "whh0": p["whh0"].T.astype(jnp.bfloat16),                # (H, 4H)
        "b0":   (p["bih0"] + p["bhh0"]).reshape(1, 4 * H).astype(jnp.float32),
        "wih1": p["wih1"].T.astype(jnp.bfloat16),                # (H, 4H)
        "whh1": p["whh1"].T.astype(jnp.bfloat16),                # (H, 4H)
        "b1":   (p["bih1"] + p["bhh1"]).reshape(1, 4 * H).astype(jnp.float32),
        "wfc":  jnp.pad(p["wfc"].T, ((0, 0), (0, O_PAD - OUTPUT_SIZE))
                        ).astype(jnp.bfloat16),                  # (H, O_PAD)
        "bfc":  jnp.pad(p["bfc"].reshape(1, -1),
                        ((0, 0), (0, O_PAD - OUTPUT_SIZE))
                        ).astype(jnp.float32),                   # (1, O_PAD)
    }


@jax.jit
def lstm_pallas(x, pp):
    B, T, I = x.shape

    # glue: layout transform + zero padding (fused under jit with the call)
    x_tm = jnp.transpose(x, (1, 0, 2)).astype(jnp.float32)        # (T, B, I)
    x_tm = jnp.pad(x_tm, ((0, 0), (0, B_PAD - B), (0, I_PAD - I)))
    x2d = x_tm.reshape(T * B_PAD, I_PAD).astype(jnp.bfloat16)     # (T*B, I_PAD)

    vmem = pl.BlockSpec(memory_space=pltpu.MemorySpace.VMEM)
    out = pl.pallas_call(
        lstm_kernel,
        out_shape=jax.ShapeDtypeStruct((B_PAD, O_PAD), jnp.float32),
        in_specs=[vmem] * 9,
        out_specs=vmem,
        scratch_shapes=[pltpu.VMEM((T * B_PAD, 4 * HIDDEN_SIZE), jnp.float32)],
        # tiny kernel (~60 KiB resident): everything lives in VMEM
        compiler_params=pltpu.CompilerParams(vmem_limit_bytes=16 * 1024 * 1024),
    )(x2d, pp["wih0"], pp["whh0"], pp["b0"], pp["wih1"], pp["whh1"],
      pp["b1"], pp["wfc"], pp["bfc"])
    return out[:B, :OUTPUT_SIZE]


def lstm_ref(x, p):
    """Pure-JAX f32 reference replicating torch.nn.LSTM + Linear + Sigmoid."""
    B, T, _ = x.shape
    H = HIDDEN_SIZE
    wih = [p["wih0"], p["wih1"]]
    whh = [p["whh0"], p["whh1"]]
    bih = [p["bih0"], p["bih1"]]
    bhh = [p["bhh0"], p["bhh1"]]
    h = [jnp.zeros((B, H), jnp.float32) for _ in range(NUM_LAYERS)]
    c = [jnp.zeros((B, H), jnp.float32) for _ in range(NUM_LAYERS)]
    for t in range(T):
        inp = x[:, t, :]
        for l in range(NUM_LAYERS):
            g = inp @ wih[l].T + bih[l] + h[l] @ whh[l].T + bhh[l]
            i = jax.nn.sigmoid(g[:, :H])
            f = jax.nn.sigmoid(g[:, H:2 * H])
            gg = jnp.tanh(g[:, 2 * H:3 * H])
            o = jax.nn.sigmoid(g[:, 3 * H:])
            c[l] = f * c[l] + i * gg
            h[l] = o * jnp.tanh(c[l])
            inp = h[l]
    return jax.nn.sigmoid(h[-1] @ p["wfc"].T + p["bfc"])


if __name__ == "__main__":
    key = jax.random.PRNGKey(0)
    kx, kp = jax.random.split(key)
    x = jax.random.normal(kx, (BATCH, SEQ_LEN, INPUT_SIZE), jnp.float32)
    params = init_params(kp)
    packed = pack_params(params)          # one-time weight prep, reused per call

    out = lstm_pallas(x, packed)
    out = jax.block_until_ready(out)

    ref = lstm_ref(x, params)
    assert out.shape == (BATCH, OUTPUT_SIZE)
    # bf16 MXU operands vs. the f32 reference -> looser tolerance (per review)
    assert jnp.allclose(out, ref, rtol=2e-2, atol=2e-2), (out, ref)
    print("KERNEL_OK")
</pallas_src>

<mosaic_0001>
module attributes {stable_mosaic.version = 11 : i64} {
  func.func @lstm_kernel(%arg0: memref<64x16xbf16, #tpu.memory_space<vmem>>, %arg1: memref<16x128xbf16, #tpu.memory_space<vmem>>, %arg2: memref<32x128xbf16, #tpu.memory_space<vmem>>, %arg3: memref<1x128xf32, #tpu.memory_space<vmem>>, %arg4: memref<32x128xbf16, #tpu.memory_space<vmem>>, %arg5: memref<32x128xbf16, #tpu.memory_space<vmem>>, %arg6: memref<1x128xf32, #tpu.memory_space<vmem>>, %arg7: memref<32x128xbf16, #tpu.memory_space<vmem>>, %arg8: memref<1x128xf32, #tpu.memory_space<vmem>>, %arg9: memref<8x128xf32, #tpu.memory_space<vmem>>, %arg10: memref<64x128xf32, #tpu.memory_space<vmem>>) attributes {dimension_semantics = [], scalar_prefetch = 0 : i64, scratch_operands = 1 : i64, tpu.core_type = #tpu.core_type<tc>} {
    %c0 = arith.constant 0 : index
    %c0_0 = arith.constant 0 : index
    %0 = vector.load %arg0[%c0, %c0_0] : memref<64x16xbf16, #tpu.memory_space<vmem>>, vector<64x16xbf16>
    %c0_1 = arith.constant 0 : index
    %c0_2 = arith.constant 0 : index
    %1 = vector.load %arg1[%c0_1, %c0_2] : memref<16x128xbf16, #tpu.memory_space<vmem>>, vector<16x128xbf16>
    %cst = arith.constant dense<0.000000e+00> : vector<64x128xf32>
    %2 = tpu.matmul %0, %1, %cst {dimension_numbers = #tpu.dot_dimension_numbers<[1], [0], [0], [1], [0, 0, 1, 1], [], []>} : vector<64x16xbf16>, vector<16x128xbf16>, vector<64x128xf32> -> vector<64x128xf32>
    %c0_3 = arith.constant 0 : index
    %c0_4 = arith.constant 0 : index
    %3 = vector.load %arg3[%c0_3, %c0_4] : memref<1x128xf32, #tpu.memory_space<vmem>>, vector<1x128xf32>
    %4 = vector.broadcast %3 : vector<1x128xf32> to vector<64x128xf32>
    %5 = arith.addf %2, %4 : vector<64x128xf32>
    %c0_5 = arith.constant 0 : index
    %c0_6 = arith.constant 0 : index
    %6 = vector.load %arg10[%c0_5, %c0_6] : memref<64x128xf32, #tpu.memory_space<vmem>>, vector<64x128xf32>
    tpu.vector_store %arg10[%c0_5, %c0_6], %5 {strides = array<i32>} : memref<64x128xf32, #tpu.memory_space<vmem>>, vector<64x128xf32>,
    %c0_7 = arith.constant 0 : index
    %c0_8 = arith.constant 0 : index
    %7 = vector.load %arg2[%c0_7, %c0_8] : memref<32x128xbf16, #tpu.memory_space<vmem>>, vector<32x128xbf16>
    %c0_9 = arith.constant 0 : index
    %c0_10 = arith.constant 0 : index
    %8 = vector.load %arg4[%c0_9, %c0_10] : memref<32x128xbf16, #tpu.memory_space<vmem>>, vector<32x128xbf16>
    %c0_11 = arith.constant 0 : index
    %c0_12 = arith.constant 0 : index
    %9 = vector.load %arg5[%c0_11, %c0_12] : memref<32x128xbf16, #tpu.memory_space<vmem>>, vector<32x128xbf16>
    %c0_13 = arith.constant 0 : index
    %c0_14 = arith.constant 0 : index
    %10 = vector.load %arg6[%c0_13, %c0_14] : memref<1x128xf32, #tpu.memory_space<vmem>>, vector<1x128xf32>
    %11 = vector.shape_cast %10 : vector<1x128xf32> to vector<1x128xf32>
    %12 = vector.broadcast %11 : vector<1x128xf32> to vector<8x128xf32>
    %cst_15 = arith.constant 0.000000e+00 : bf16
    %13 = vector.broadcast %cst_15 : bf16 to vector<8x32xbf16>
    %cst_16 = arith.constant 0.000000e+00 : f32
    %14 = vector.broadcast %cst_16 : f32 to vector<8x32xf32>
    %c0_i32 = arith.constant 0 : i32
    %cst_17 = arith.constant dense<0.000000e+00> : vector<8x128xf32>
    %15 = tpu.matmul %13, %9, %cst_17 {dimension_numbers = #tpu.dot_dimension_numbers<[1], [0], [0], [1], [0, 0, 1, 1], [], []>} : vector<8x32xbf16>, vector<32x128xbf16>, vector<8x128xf32> -> vector<8x128xf32>
    %16 = arith.addf %15, %12 : vector<8x128xf32>
    %c8_i32 = arith.constant 8 : i32
    %17 = arith.muli %c0_i32, %c8_i32 : i32
    %18 = tpu.assume_multiple %17, 8 : i32
    %19 = arith.index_cast %18 : i32 to index
    %c0_18 = arith.constant 0 : index
    %20 = vector.load %arg10[%19, %c0_18] : memref<64x128xf32, #tpu.memory_space<vmem>>, vector<8x128xf32>
    %cst_19 = arith.constant dense<0.000000e+00> : vector<8x128xf32>
    %21 = tpu.matmul %13, %7, %cst_19 {dimension_numbers = #tpu.dot_dimension_numbers<[1], [0], [0], [1], [0, 0, 1, 1], [], []>} : vector<8x32xbf16>, vector<32x128xbf16>, vector<8x128xf32> -> vector<8x128xf32>
    %22 = arith.addf %20, %21 : vector<8x128xf32>
    %23 = arith.negf %22 : vector<8x128xf32>
    %24 = math.exp %23 : vector<8x128xf32>
    %cst_20 = arith.constant 1.000000e+00 : f32
    %25 = vector.broadcast %cst_20 : f32 to vector<8x128xf32>
    %26 = arith.addf %25, %24 : vector<8x128xf32>
    %27 = arith.divf %25, %26 : vector<8x128xf32>
    %28 = math.tanh %22 : vector<8x128xf32>
    %29 = vector.extract_strided_slice %27 {offsets = [0, 0], sizes = [8, 32], strides = [1, 1]} : vector<8x128xf32> to vector<8x32xf32>
    %30 = vector.extract_strided_slice %27 {offsets = [0, 32], sizes = [8, 32], strides = [1, 1]} : vector<8x128xf32> to vector<8x32xf32>
    %31 = vector.extract_strided_slice %28 {offsets = [0, 64], sizes = [8, 32], strides = [1, 1]} : vector<8x128xf32> to vector<8x32xf32>
    %32 = vector.extract_strided_slice %27 {offsets = [0, 96], sizes = [8, 32], strides = [1, 1]} : vector<8x128xf32> to vector<8x32xf32>
    %33 = arith.mulf %30, %14 : vector<8x32xf32>
    %34 = arith.mulf %29, %31 : vector<8x32xf32>
    %35 = arith.addf %33, %34 : vector<8x32xf32>
    %36 = math.tanh %35 : vector<8x32xf32>
    %37 = arith.mulf %32, %36 : vector<8x32xf32>
    %38 = arith.truncf %37 : vector<8x32xf32> to vector<8x32xbf16>
    %cst_21 = arith.constant dense<0.000000e+00> : vector<8x128xf32>
    %39 = tpu.matmul %38, %8, %cst_21 {dimension_numbers = #tpu.dot_dimension_numbers<[1], [0], [0], [1], [0, 0, 1, 1], [], []>} : vector<8x32xbf16>, vector<32x128xbf16>, vector<8x128xf32> -> vector<8x128xf32>
    %40 = arith.addf %39, %16 : vector<8x128xf32>
    %41 = arith.negf %40 : vector<8x128xf32>
    %42 = math.exp %41 : vector<8x128xf32>
    %cst_22 = arith.constant 1.000000e+00 : f32
    %43 = vector.broadcast %cst_22 : f32 to vector<8x128xf32>
    %44 = arith.addf %43, %42 : vector<8x128xf32>
    %45 = arith.divf %43, %44 : vector<8x128xf32>
    %46 = math.tanh %40 : vector<8x128xf32>
    %47 = vector.extract_strided_slice %45 {offsets = [0, 0], sizes = [8, 32], strides = [1, 1]} : vector<8x128xf32> to vector<8x32xf32>
    %48 = vector.extract_strided_slice %45 {offsets = [0, 32], sizes = [8, 32], strides = [1, 1]} : vector<8x128xf32> to vector<8x32xf32>
    %49 = vector.extract_strided_slice %46 {offsets = [0, 64], sizes = [8, 32], strides = [1, 1]} : vector<8x128xf32> to vector<8x32xf32>
    %50 = vector.extract_strided_slice %45 {offsets = [0, 96], sizes = [8, 32], strides = [1, 1]} : vector<8x128xf32> to vector<8x32xf32>
    %51 = arith.mulf %48, %14 : vector<8x32xf32>
    %52 = arith.mulf %47, %49 : vector<8x32xf32>
    %53 = arith.addf %51, %52 : vector<8x32xf32>
    %54 = math.tanh %53 : vector<8x32xf32>
    %55 = arith.mulf %50, %54 : vector<8x32xf32>
    %56 = arith.truncf %55 : vector<8x32xf32> to vector<8x32xbf16>
    %c1_i32 = arith.constant 1 : i32
    %cst_23 = arith.constant dense<0.000000e+00> : vector<8x128xf32>
    %57 = tpu.matmul %56, %9, %cst_23 {dimension_numbers = #tpu.dot_dimension_numbers<[1], [0], [0], [1], [0, 0, 1, 1], [], []>} : vector<8x32xbf16>, vector<32x128xbf16>, vector<8x128xf32> -> vector<8x128xf32>
    %58 = arith.addf %57, %12 : vector<8x128xf32>
    %c8_i32_24 = arith.constant 8 : i32
    %59 = arith.muli %c1_i32, %c8_i32_24 : i32
    %60 = tpu.assume_multiple %59, 8 : i32
    %61 = arith.index_cast %60 : i32 to index
    %c0_25 = arith.constant 0 : index
    %62 = vector.load %arg10[%61, %c0_25] : memref<64x128xf32, #tpu.memory_space<vmem>>, vector<8x128xf32>
    %cst_26 = arith.constant dense<0.000000e+00> : vector<8x128xf32>
    %63 = tpu.matmul %38, %7, %cst_26 {dimension_numbers = #tpu.dot_dimension_numbers<[1], [0], [0], [1], [0, 0, 1, 1], [], []>} : vector<8x32xbf16>, vector<32x128xbf16>, vector<8x128xf32> -> vector<8x128xf32>
    %64 = arith.addf %62, %63 : vector<8x128xf32>
    %65 = arith.negf %64 : vector<8x128xf32>
    %66 = math.exp %65 : vector<8x128xf32>
    %cst_27 = arith.constant 1.000000e+00 : f32
    %67 = vector.broadcast %cst_27 : f32 to vector<8x128xf32>
    %68 = arith.addf %67, %66 : vector<8x128xf32>
    %69 = arith.divf %67, %68 : vector<8x128xf32>
    %70 = math.tanh %64 : vector<8x128xf32>
    %71 = vector.extract_strided_slice %69 {offsets = [0, 0], sizes = [8, 32], strides = [1, 1]} : vector<8x128xf32> to vector<8x32xf32>
    %72 = vector.extract_strided_slice %69 {offsets = [0, 32], sizes = [8, 32], strides = [1, 1]} : vector<8x128xf32> to vector<8x32xf32>
    %73 = vector.extract_strided_slice %70 {offsets = [0, 64], sizes = [8, 32], strides = [1, 1]} : vector<8x128xf32> to vector<8x32xf32>
    %74 = vector.extract_strided_slice %69 {offsets = [0, 96], sizes = [8, 32], strides = [1, 1]} : vector<8x128xf32> to vector<8x32xf32>
    %75 = arith.mulf %72, %35 : vector<8x32xf32>
    %76 = arith.mulf %71, %73 : vector<8x32xf32>
    %77 = arith.addf %75, %76 : vector<8x32xf32>
    %78 = math.tanh %77 : vector<8x32xf32>
    %79 = arith.mulf %74, %78 : vector<8x32xf32>
    %80 = arith.truncf %79 : vector<8x32xf32> to vector<8x32xbf16>
    %cst_28 = arith.constant dense<0.000000e+00> : vector<8x128xf32>
    %81 = tpu.matmul %80, %8, %cst_28 {dimension_numbers = #tpu.dot_dimension_numbers<[1], [0], [0], [1], [0, 0, 1, 1], [], []>} : vector<8x32xbf16>, vector<32x128xbf16>, vector<8x128xf32> -> vector<8x128xf32>
    %82 = arith.addf %81, %58 : vector<8x128xf32>
    %83 = arith.negf %82 : vector<8x128xf32>
    %84 = math.exp %83 : vector<8x128xf32>
    %cst_29 = arith.constant 1.000000e+00 : f32
    %85 = vector.broadcast %cst_29 : f32 to vector<8x128xf32>
    %86 = arith.addf %85, %84 : vector<8x128xf32>
    %87 = arith.divf %85, %86 : vector<8x128xf32>
    %88 = math.tanh %82 : vector<8x128xf32>
    %89 = vector.extract_strided_slice %87 {offsets = [0, 0], sizes = [8, 32], strides = [1, 1]} : vector<8x128xf32> to vector<8x32xf32>
    %90 = vector.extract_strided_slice %87 {offsets = [0, 32], sizes = [8, 32], strides = [1, 1]} : vector<8x128xf32> to vector<8x32xf32>
    %91 = vector.extract_strided_slice %88 {offsets = [0, 64], sizes = [8, 32], strides = [1, 1]} : vector<8x128xf32> to vector<8x32xf32>
    %92 = vector.extract_strided_slice %87 {offsets = [0, 96], sizes = [8, 32], strides = [1, 1]} : vector<8x128xf32> to vector<8x32xf32>
    %93 = arith.mulf %90, %53 : vector<8x32xf32>
    %94 = arith.mulf %89, %91 : vector<8x32xf32>
    %95 = arith.addf %93, %94 : vector<8x32xf32>
    %96 = math.tanh %95 : vector<8x32xf32>
    %97 = arith.mulf %92, %96 : vector<8x32xf32>
    %98 = arith.truncf %97 : vector<8x32xf32> to vector<8x32xbf16>
    %c2_i32 = arith.constant 2 : i32
    %cst_30 = arith.constant dense<0.000000e+00> : vector<8x128xf32>
    %99 = tpu.matmul %98, %9, %cst_30 {dimension_numbers = #tpu.dot_dimension_numbers<[1], [0], [0], [1], [0, 0, 1, 1], [], []>} : vector<8x32xbf16>, vector<32x128xbf16>, vector<8x128xf32> -> vector<8x128xf32>
    %100 = arith.addf %99, %12 : vector<8x128xf32>
    %c8_i32_31 = arith.constant 8 : i32
    %101 = arith.muli %c2_i32, %c8_i32_31 : i32
    %102 = tpu.assume_multiple %101, 8 : i32
    %103 = arith.index_cast %102 : i32 to index
    %c0_32 = arith.constant 0 : index
    %104 = vector.load %arg10[%103, %c0_32] : memref<64x128xf32, #tpu.memory_space<vmem>>, vector<8x128xf32>
    %cst_33 = arith.constant dense<0.000000e+00> : vector<8x128xf32>
    %105 = tpu.matmul %80, %7, %cst_33 {dimension_numbers = #tpu.dot_dimension_numbers<[1], [0], [0], [1], [0, 0, 1, 1], [], []>} : vector<8x32xbf16>, vector<32x128xbf16>, vector<8x128xf32> -> vector<8x128xf32>
    %106 = arith.addf %104, %105 : vector<8x128xf32>
    %107 = arith.negf %106 : vector<8x128xf32>
    %108 = math.exp %107 : vector<8x128xf32>
    %cst_34 = arith.constant 1.000000e+00 : f32
    %109 = vector.broadcast %cst_34 : f32 to vector<8x128xf32>
    %110 = arith.addf %109, %108 : vector<8x128xf32>
    %111 = arith.divf %109, %110 : vector<8x128xf32>
    %112 = math.tanh %106 : vector<8x128xf32>
    %113 = vector.extract_strided_slice %111 {offsets = [0, 0], sizes = [8, 32], strides = [1, 1]} : vector<8x128xf32> to vector<8x32xf32>
    %114 = vector.extract_strided_slice %111 {offsets = [0, 32], sizes = [8, 32], strides = [1, 1]} : vector<8x128xf32> to vector<8x32xf32>
    %115 = vector.extract_strided_slice %112 {offsets = [0, 64], sizes = [8, 32], strides = [1, 1]} : vector<8x128xf32> to vector<8x32xf32>
    %116 = vector.extract_strided_slice %111 {offsets = [0, 96], sizes = [8, 32], strides = [1, 1]} : vector<8x128xf32> to vector<8x32xf32>
    %117 = arith.mulf %114, %77 : vector<8x32xf32>
    %118 = arith.mulf %113, %115 : vector<8x32xf32>
    %119 = arith.addf %117, %118 : vector<8x32xf32>
    %120 = math.tanh %119 : vector<8x32xf32>
    %121 = arith.mulf %116, %120 : vector<8x32xf32>
    %122 = arith.truncf %121 : vector<8x32xf32> to vector<8x32xbf16>
    %cst_35 = arith.constant dense<0.000000e+00> : vector<8x128xf32>
    %123 = tpu.matmul %122, %8, %cst_35 {dimension_numbers = #tpu.dot_dimension_numbers<[1], [0], [0], [1], [0, 0, 1, 1], [], []>} : vector<8x32xbf16>, vector<32x128xbf16>, vector<8x128xf32> -> vector<8x128xf32>
    %124 = arith.addf %123, %100 : vector<8x128xf32>
    %125 = arith.negf %124 : vector<8x128xf32>
    %126 = math.exp %125 : vector<8x128xf32>
    %cst_36 = arith.constant 1.000000e+00 : f32
    %127 = vector.broadcast %cst_36 : f32 to vector<8x128xf32>
    %128 = arith.addf %127, %126 : vector<8x128xf32>
    %129 = arith.divf %127, %128 : vector<8x128xf32>
    %130 = math.tanh %124 : vector<8x128xf32>
    %131 = vector.extract_strided_slice %129 {offsets = [0, 0], sizes = [8, 32], strides = [1, 1]} : vector<8x128xf32> to vector<8x32xf32>
    %132 = vector.extract_strided_slice %129 {offsets = [0, 32], sizes = [8, 32], strides = [1, 1]} : vector<8x128xf32> to vector<8x32xf32>
    %133 = vector.extract_strided_slice %130 {offsets = [0, 64], sizes = [8, 32], strides = [1, 1]} : vector<8x128xf32> to vector<8x32xf32>
    %134 = vector.extract_strided_slice %129 {offsets = [0, 96], sizes = [8, 32], strides = [1, 1]} : vector<8x128xf32> to vector<8x32xf32>
    %135 = arith.mulf %132, %95 : vector<8x32xf32>
    %136 = arith.mulf %131, %133 : vector<8x32xf32>
    %137 = arith.addf %135, %136 : vector<8x32xf32>
    %138 = math.tanh %137 : vector<8x32xf32>
    %139 = arith.mulf %134, %138 : vector<8x32xf32>
    %140 = arith.truncf %139 : vector<8x32xf32> to vector<8x32xbf16>
    %c3_i32 = arith.constant 3 : i32
    %cst_37 = arith.constant dense<0.000000e+00> : vector<8x128xf32>
    %141 = tpu.matmul %140, %9, %cst_37 {dimension_numbers = #tpu.dot_dimension_numbers<[1], [0], [0], [1], [0, 0, 1, 1], [], []>} : vector<8x32xbf16>, vector<32x128xbf16>, vector<8x128xf32> -> vector<8x128xf32>
    %142 = arith.addf %141, %12 : vector<8x128xf32>
    %c8_i32_38 = arith.constant 8 : i32
    %143 = arith.muli %c3_i32, %c8_i32_38 : i32
    %144 = tpu.assume_multiple %143, 8 : i32
    %145 = arith.index_cast %144 : i32 to index
    %c0_39 = arith.constant 0 : index
    %146 = vector.load %arg10[%145, %c0_39] : memref<64x128xf32, #tpu.memory_space<vmem>>, vector<8x128xf32>
    %cst_40 = arith.constant dense<0.000000e+00> : vector<8x128xf32>
    %147 = tpu.matmul %122, %7, %cst_40 {dimension_numbers = #tpu.dot_dimension_numbers<[1], [0], [0], [1], [0, 0, 1, 1], [], []>} : vector<8x32xbf16>, vector<32x128xbf16>, vector<8x128xf32> -> vector<8x128xf32>
    %148 = arith.addf %146, %147 : vector<8x128xf32>
    %149 = arith.negf %148 : vector<8x128xf32>
    %150 = math.exp %149 : vector<8x128xf32>
    %cst_41 = arith.constant 1.000000e+00 : f32
    %151 = vector.broadcast %cst_41 : f32 to vector<8x128xf32>
    %152 = arith.addf %151, %150 : vector<8x128xf32>
    %153 = arith.divf %151, %152 : vector<8x128xf32>
    %154 = math.tanh %148 : vector<8x128xf32>
    %155 = vector.extract_strided_slice %153 {offsets = [0, 0], sizes = [8, 32], strides = [1, 1]} : vector<8x128xf32> to vector<8x32xf32>
    %156 = vector.extract_strided_slice %153 {offsets = [0, 32], sizes = [8, 32], strides = [1, 1]} : vector<8x128xf32> to vector<8x32xf32>
    %157 = vector.extract_strided_slice %154 {offsets = [0, 64], sizes = [8, 32], strides = [1, 1]} : vector<8x128xf32> to vector<8x32xf32>
    %158 = vector.extract_strided_slice %153 {offsets = [0, 96], sizes = [8, 32], strides = [1, 1]} : vector<8x128xf32> to vector<8x32xf32>
    %159 = arith.mulf %156, %119 : vector<8x32xf32>
    %160 = arith.mulf %155, %157 : vector<8x32xf32>
    %161 = arith.addf %159, %160 : vector<8x32xf32>
    %162 = math.tanh %161 : vector<8x32xf32>
    %163 = arith.mulf %158, %162 : vector<8x32xf32>
    %164 = arith.truncf %163 : vector<8x32xf32> to vector<8x32xbf16>
    %cst_42 = arith.constant dense<0.000000e+00> : vector<8x128xf32>
    %165 = tpu.matmul %164, %8, %cst_42 {dimension_numbers = #tpu.dot_dimension_numbers<[1], [0], [0], [1], [0, 0, 1, 1], [], []>} : vector<8x32xbf16>, vector<32x128xbf16>, vector<8x128xf32> -> vector<8x128xf32>
    %166 = arith.addf %165, %142 : vector<8x128xf32>
    %167 = arith.negf %166 : vector<8x128xf32>
    %168 = math.exp %167 : vector<8x128xf32>
    %cst_43 = arith.constant 1.000000e+00 : f32
    %169 = vector.broadcast %cst_43 : f32 to vector<8x128xf32>
    %170 = arith.addf %169, %168 : vector<8x128xf32>
    %171 = arith.divf %169, %170 : vector<8x128xf32>
    %172 = math.tanh %166 : vector<8x128xf32>
    %173 = vector.extract_strided_slice %171 {offsets = [0, 0], sizes = [8, 32], strides = [1, 1]} : vector<8x128xf32> to vector<8x32xf32>
    %174 = vector.extract_strided_slice %171 {offsets = [0, 32], sizes = [8, 32], strides = [1, 1]} : vector<8x128xf32> to vector<8x32xf32>
    %175 = vector.extract_strided_slice %172 {offsets = [0, 64], sizes = [8, 32], strides = [1, 1]} : vector<8x128xf32> to vector<8x32xf32>
    %176 = vector.extract_strided_slice %171 {offsets = [0, 96], sizes = [8, 32], strides = [1, 1]} : vector<8x128xf32> to vector<8x32xf32>
    %177 = arith.mulf %174, %137 : vector<8x32xf32>
    %178 = arith.mulf %173, %175 : vector<8x32xf32>
    %179 = arith.addf %177, %178 : vector<8x32xf32>
    %180 = math.tanh %179 : vector<8x32xf32>
    %181 = arith.mulf %176, %180 : vector<8x32xf32>
    %182 = arith.truncf %181 : vector<8x32xf32> to vector<8x32xbf16>
    %c4_i32 = arith.constant 4 : i32
    %cst_44 = arith.constant dense<0.000000e+00> : vector<8x128xf32>
    %183 = tpu.matmul %182, %9, %cst_44 {dimension_numbers = #tpu.dot_dimension_numbers<[1], [0], [0], [1], [0, 0, 1, 1], [], []>} : vector<8x32xbf16>, vector<32x128xbf16>, vector<8x128xf32> -> vector<8x128xf32>
    %184 = arith.addf %183, %12 : vector<8x128xf32>
    %c8_i32_45 = arith.constant 8 : i32
    %185 = arith.muli %c4_i32, %c8_i32_45 : i32
    %186 = tpu.assume_multiple %185, 8 : i32
    %187 = arith.index_cast %186 : i32 to index
    %c0_46 = arith.constant 0 : index
    %188 = vector.load %arg10[%187, %c0_46] : memref<64x128xf32, #tpu.memory_space<vmem>>, vector<8x128xf32>
    %cst_47 = arith.constant dense<0.000000e+00> : vector<8x128xf32>
    %189 = tpu.matmul %164, %7, %cst_47 {dimension_numbers = #tpu.dot_dimension_numbers<[1], [0], [0], [1], [0, 0, 1, 1], [], []>} : vector<8x32xbf16>, vector<32x128xbf16>, vector<8x128xf32> -> vector<8x128xf32>
    %190 = arith.addf %188, %189 : vector<8x128xf32>
    %191 = arith.negf %190 : vector<8x128xf32>
    %192 = math.exp %191 : vector<8x128xf32>
    %cst_48 = arith.constant 1.000000e+00 : f32
    %193 = vector.broadcast %cst_48 : f32 to vector<8x128xf32>
    %194 = arith.addf %193, %192 : vector<8x128xf32>
    %195 = arith.divf %193, %194 : vector<8x128xf32>
    %196 = math.tanh %190 : vector<8x128xf32>
    %197 = vector.extract_strided_slice %195 {offsets = [0, 0], sizes = [8, 32], strides = [1, 1]} : vector<8x128xf32> to vector<8x32xf32>
    %198 = vector.extract_strided_slice %195 {offsets = [0, 32], sizes = [8, 32], strides = [1, 1]} : vector<8x128xf32> to vector<8x32xf32>
    %199 = vector.extract_strided_slice %196 {offsets = [0, 64], sizes = [8, 32], strides = [1, 1]} : vector<8x128xf32> to vector<8x32xf32>
    %200 = vector.extract_strided_slice %195 {offsets = [0, 96], sizes = [8, 32], strides = [1, 1]} : vector<8x128xf32> to vector<8x32xf32>
    %201 = arith.mulf %198, %161 : vector<8x32xf32>
    %202 = arith.mulf %197, %199 : vector<8x32xf32>
    %203 = arith.addf %201, %202 : vector<8x32xf32>
    %204 = math.tanh %203 : vector<8x32xf32>
    %205 = arith.mulf %200, %204 : vector<8x32xf32>
    %206 = arith.truncf %205 : vector<8x32xf32> to vector<8x32xbf16>
    %cst_49 = arith.constant dense<0.000000e+00> : vector<8x128xf32>
    %207 = tpu.matmul %206, %8, %cst_49 {dimension_numbers = #tpu.dot_dimension_numbers<[1], [0], [0], [1], [0, 0, 1, 1], [], []>} : vector<8x32xbf16>, vector<32x128xbf16>, vector<8x128xf32> -> vector<8x128xf32>
    %208 = arith.addf %207, %184 : vector<8x128xf32>
    %209 = arith.negf %208 : vector<8x128xf32>
    %210 = math.exp %209 : vector<8x128xf32>
    %cst_50 = arith.constant 1.000000e+00 : f32
    %211 = vector.broadcast %cst_50 : f32 to vector<8x128xf32>
    %212 = arith.addf %211, %210 : vector<8x128xf32>
    %213 = arith.divf %211, %212 : vector<8x128xf32>
    %214 = math.tanh %208 : vector<8x128xf32>
    %215 = vector.extract_strided_slice %213 {offsets = [0, 0], sizes = [8, 32], strides = [1, 1]} : vector<8x128xf32> to vector<8x32xf32>
    %216 = vector.extract_strided_slice %213 {offsets = [0, 32], sizes = [8, 32], strides = [1, 1]} : vector<8x128xf32> to vector<8x32xf32>
    %217 = vector.extract_strided_slice %214 {offsets = [0, 64], sizes = [8, 32], strides = [1, 1]} : vector<8x128xf32> to vector<8x32xf32>
    %218 = vector.extract_strided_slice %213 {offsets = [0, 96], sizes = [8, 32], strides = [1, 1]} : vector<8x128xf32> to vector<8x32xf32>
    %219 = arith.mulf %216, %179 : vector<8x32xf32>
    %220 = arith.mulf %215, %217 : vector<8x32xf32>
    %221 = arith.addf %219, %220 : vector<8x32xf32>
    %222 = math.tanh %221 : vector<8x32xf32>
    %223 = arith.mulf %218, %222 : vector<8x32xf32>
    %224 = arith.truncf %223 : vector<8x32xf32> to vector<8x32xbf16>
    %c5_i32 = arith.constant 5 : i32
    %cst_51 = arith.constant dense<0.000000e+00> : vector<8x128xf32>
    %225 = tpu.matmul %224, %9, %cst_51 {dimension_numbers = #tpu.dot_dimension_numbers<[1], [0], [0], [1], [0, 0, 1, 1], [], []>} : vector<8x32xbf16>, vector<32x128xbf16>, vector<8x128xf32> -> vector<8x128xf32>
    %226 = arith.addf %225, %12 : vector<8x128xf32>
    %c8_i32_52 = arith.constant 8 : i32
    %227 = arith.muli %c5_i32, %c8_i32_52 : i32
    %228 = tpu.assume_multiple %227, 8 : i32
    %229 = arith.index_cast %228 : i32 to index
    %c0_53 = arith.constant 0 : index
    %230 = vector.load %arg10[%229, %c0_53] : memref<64x128xf32, #tpu.memory_space<vmem>>, vector<8x128xf32>
    %cst_54 = arith.constant dense<0.000000e+00> : vector<8x128xf32>
    %231 = tpu.matmul %206, %7, %cst_54 {dimension_numbers = #tpu.dot_dimension_numbers<[1], [0], [0], [1], [0, 0, 1, 1], [], []>} : vector<8x32xbf16>, vector<32x128xbf16>, vector<8x128xf32> -> vector<8x128xf32>
    %232 = arith.addf %230, %231 : vector<8x128xf32>
    %233 = arith.negf %232 : vector<8x128xf32>
    %234 = math.exp %233 : vector<8x128xf32>
    %cst_55 = arith.constant 1.000000e+00 : f32
    %235 = vector.broadcast %cst_55 : f32 to vector<8x128xf32>
    %236 = arith.addf %235, %234 : vector<8x128xf32>
    %237 = arith.divf %235, %236 : vector<8x128xf32>
    %238 = math.tanh %232 : vector<8x128xf32>
    %239 = vector.extract_strided_slice %237 {offsets = [0, 0], sizes = [8, 32], strides = [1, 1]} : vector<8x128xf32> to vector<8x32xf32>
    %240 = vector.extract_strided_slice %237 {offsets = [0, 32], sizes = [8, 32], strides = [1, 1]} : vector<8x128xf32> to vector<8x32xf32>
    %241 = vector.extract_strided_slice %238 {offsets = [0, 64], sizes = [8, 32], strides = [1, 1]} : vector<8x128xf32> to vector<8x32xf32>
    %242 = vector.extract_strided_slice %237 {offsets = [0, 96], sizes = [8, 32], strides = [1, 1]} : vector<8x128xf32> to vector<8x32xf32>
    %243 = arith.mulf %240, %203 : vector<8x32xf32>
    %244 = arith.mulf %239, %241 : vector<8x32xf32>
    %245 = arith.addf %243, %244 : vector<8x32xf32>
    %246 = math.tanh %245 : vector<8x32xf32>
    %247 = arith.mulf %242, %246 : vector<8x32xf32>
    %248 = arith.truncf %247 : vector<8x32xf32> to vector<8x32xbf16>
    %cst_56 = arith.constant dense<0.000000e+00> : vector<8x128xf32>
    %249 = tpu.matmul %248, %8, %cst_56 {dimension_numbers = #tpu.dot_dimension_numbers<[1], [0], [0], [1], [0, 0, 1, 1], [], []>} : vector<8x32xbf16>, vector<32x128xbf16>, vector<8x128xf32> -> vector<8x128xf32>
    %250 = arith.addf %249, %226 : vector<8x128xf32>
    %251 = arith.negf %250 : vector<8x128xf32>
    %252 = math.exp %251 : vector<8x128xf32>
    %cst_57 = arith.constant 1.000000e+00 : f32
    %253 = vector.broadcast %cst_57 : f32 to vector<8x128xf32>
    %254 = arith.addf %253, %252 : vector<8x128xf32>
    %255 = arith.divf %253, %254 : vector<8x128xf32>
    %256 = math.tanh %250 : vector<8x128xf32>
    %257 = vector.extract_strided_slice %255 {offsets = [0, 0], sizes = [8, 32], strides = [1, 1]} : vector<8x128xf32> to vector<8x32xf32>
    %258 = vector.extract_strided_slice %255 {offsets = [0, 32], sizes = [8, 32], strides = [1, 1]} : vector<8x128xf32> to vector<8x32xf32>
    %259 = vector.extract_strided_slice %256 {offsets = [0, 64], sizes = [8, 32], strides = [1, 1]} : vector<8x128xf32> to vector<8x32xf32>
    %260 = vector.extract_strided_slice %255 {offsets = [0, 96], sizes = [8, 32], strides = [1, 1]} : vector<8x128xf32> to vector<8x32xf32>
    %261 = arith.mulf %258, %221 : vector<8x32xf32>
    %262 = arith.mulf %257, %259 : vector<8x32xf32>
    %263 = arith.addf %261, %262 : vector<8x32xf32>
    %264 = math.tanh %263 : vector<8x32xf32>
    %265 = arith.mulf %260, %264 : vector<8x32xf32>
    %266 = arith.truncf %265 : vector<8x32xf32> to vector<8x32xbf16>
    %c6_i32 = arith.constant 6 : i32
    %cst_58 = arith.constant dense<0.000000e+00> : vector<8x128xf32>
    %267 = tpu.matmul %266, %9, %cst_58 {dimension_numbers = #tpu.dot_dimension_numbers<[1], [0], [0], [1], [0, 0, 1, 1], [], []>} : vector<8x32xbf16>, vector<32x128xbf16>, vector<8x128xf32> -> vector<8x128xf32>
    %268 = arith.addf %267, %12 : vector<8x128xf32>
    %c8_i32_59 = arith.constant 8 : i32
    %269 = arith.muli %c6_i32, %c8_i32_59 : i32
    %270 = tpu.assume_multiple %269, 8 : i32
    %271 = arith.index_cast %270 : i32 to index
    %c0_60 = arith.constant 0 : index
    %272 = vector.load %arg10[%271, %c0_60] : memref<64x128xf32, #tpu.memory_space<vmem>>, vector<8x128xf32>
    %cst_61 = arith.constant dense<0.000000e+00> : vector<8x128xf32>
    %273 = tpu.matmul %248, %7, %cst_61 {dimension_numbers = #tpu.dot_dimension_numbers<[1], [0], [0], [1], [0, 0, 1, 1], [], []>} : vector<8x32xbf16>, vector<32x128xbf16>, vector<8x128xf32> -> vector<8x128xf32>
    %274 = arith.addf %272, %273 : vector<8x128xf32>
    %275 = arith.negf %274 : vector<8x128xf32>
    %276 = math.exp %275 : vector<8x128xf32>
    %cst_62 = arith.constant 1.000000e+00 : f32
    %277 = vector.broadcast %cst_62 : f32 to vector<8x128xf32>
    %278 = arith.addf %277, %276 : vector<8x128xf32>
    %279 = arith.divf %277, %278 : vector<8x128xf32>
    %280 = math.tanh %274 : vector<8x128xf32>
    %281 = vector.extract_strided_slice %279 {offsets = [0, 0], sizes = [8, 32], strides = [1, 1]} : vector<8x128xf32> to vector<8x32xf32>
    %282 = vector.extract_strided_slice %279 {offsets = [0, 32], sizes = [8, 32], strides = [1, 1]} : vector<8x128xf32> to vector<8x32xf32>
    %283 = vector.extract_strided_slice %280 {offsets = [0, 64], sizes = [8, 32], strides = [1, 1]} : vector<8x128xf32> to vector<8x32xf32>
    %284 = vector.extract_strided_slice %279 {offsets = [0, 96], sizes = [8, 32], strides = [1, 1]} : vector<8x128xf32> to vector<8x32xf32>
    %285 = arith.mulf %282, %245 : vector<8x32xf32>
    %286 = arith.mulf %281, %283 : vector<8x32xf32>
    %287 = arith.addf %285, %286 : vector<8x32xf32>
    %288 = math.tanh %287 : vector<8x32xf32>
    %289 = arith.mulf %284, %288 : vector<8x32xf32>
    %290 = arith.truncf %289 : vector<8x32xf32> to vector<8x32xbf16>
    %cst_63 = arith.constant dense<0.000000e+00> : vector<8x128xf32>
    %291 = tpu.matmul %290, %8, %cst_63 {dimension_numbers = #tpu.dot_dimension_numbers<[1], [0], [0], [1], [0, 0, 1, 1], [], []>} : vector<8x32xbf16>, vector<32x128xbf16>, vector<8x128xf32> -> vector<8x128xf32>
    %292 = arith.addf %291, %268 : vector<8x128xf32>
    %293 = arith.negf %292 : vector<8x128xf32>
    %294 = math.exp %293 : vector<8x128xf32>
    %cst_64 = arith.constant 1.000000e+00 : f32
    %295 = vector.broadcast %cst_64 : f32 to vector<8x128xf32>
    %296 = arith.addf %295, %294 : vector<8x128xf32>
    %297 = arith.divf %295, %296 : vector<8x128xf32>
    %298 = math.tanh %292 : vector<8x128xf32>
    %299 = vector.extract_strided_slice %297 {offsets = [0, 0], sizes = [8, 32], strides = [1, 1]} : vector<8x128xf32> to vector<8x32xf32>
    %300 = vector.extract_strided_slice %297 {offsets = [0, 32], sizes = [8, 32], strides = [1, 1]} : vector<8x128xf32> to vector<8x32xf32>
    %301 = vector.extract_strided_slice %298 {offsets = [0, 64], sizes = [8, 32], strides = [1, 1]} : vector<8x128xf32> to vector<8x32xf32>
    %302 = vector.extract_strided_slice %297 {offsets = [0, 96], sizes = [8, 32], strides = [1, 1]} : vector<8x128xf32> to vector<8x32xf32>
    %303 = arith.mulf %300, %263 : vector<8x32xf32>
    %304 = arith.mulf %299, %301 : vector<8x32xf32>
    %305 = arith.addf %303, %304 : vector<8x32xf32>
    %306 = math.tanh %305 : vector<8x32xf32>
    %307 = arith.mulf %302, %306 : vector<8x32xf32>
    %308 = arith.truncf %307 : vector<8x32xf32> to vector<8x32xbf16>
    %c7_i32 = arith.constant 7 : i32
    %cst_65 = arith.constant dense<0.000000e+00> : vector<8x128xf32>
    %309 = tpu.matmul %308, %9, %cst_65 {dimension_numbers = #tpu.dot_dimension_numbers<[1], [0], [0], [1], [0, 0, 1, 1], [], []>} : vector<8x32xbf16>, vector<32x128xbf16>, vector<8x128xf32> -> vector<8x128xf32>
    %310 = arith.addf %309, %12 : vector<8x128xf32>
    %c8_i32_66 = arith.constant 8 : i32
    %311 = arith.muli %c7_i32, %c8_i32_66 : i32
    %312 = tpu.assume_multiple %311, 8 : i32
    %313 = arith.index_cast %312 : i32 to index
    %c0_67 = arith.constant 0 : index
    %314 = vector.load %arg10[%313, %c0_67] : memref<64x128xf32, #tpu.memory_space<vmem>>, vector<8x128xf32>
    %cst_68 = arith.constant dense<0.000000e+00> : vector<8x128xf32>
    %315 = tpu.matmul %290, %7, %cst_68 {dimension_numbers = #tpu.dot_dimension_numbers<[1], [0], [0], [1], [0, 0, 1, 1], [], []>} : vector<8x32xbf16>, vector<32x128xbf16>, vector<8x128xf32> -> vector<8x128xf32>
    %316 = arith.addf %314, %315 : vector<8x128xf32>
    %317 = arith.negf %316 : vector<8x128xf32>
    %318 = math.exp %317 : vector<8x128xf32>
    %cst_69 = arith.constant 1.000000e+00 : f32
    %319 = vector.broadcast %cst_69 : f32 to vector<8x128xf32>
    %320 = arith.addf %319, %318 : vector<8x128xf32>
    %321 = arith.divf %319, %320 : vector<8x128xf32>
    %322 = math.tanh %316 : vector<8x128xf32>
    %323 = vector.extract_strided_slice %321 {offsets = [0, 0], sizes = [8, 32], strides = [1, 1]} : vector<8x128xf32> to vector<8x32xf32>
    %324 = vector.extract_strided_slice %321 {offsets = [0, 32], sizes = [8, 32], strides = [1, 1]} : vector<8x128xf32> to vector<8x32xf32>
    %325 = vector.extract_strided_slice %322 {offsets = [0, 64], sizes = [8, 32], strides = [1, 1]} : vector<8x128xf32> to vector<8x32xf32>
    %326 = vector.extract_strided_slice %321 {offsets = [0, 96], sizes = [8, 32], strides = [1, 1]} : vector<8x128xf32> to vector<8x32xf32>
    %327 = arith.mulf %324, %287 : vector<8x32xf32>
    %328 = arith.mulf %323, %325 : vector<8x32xf32>
    %329 = arith.addf %327, %328 : vector<8x32xf32>
    %330 = math.tanh %329 : vector<8x32xf32>
    %331 = arith.mulf %326, %330 : vector<8x32xf32>
    %332 = arith.truncf %331 : vector<8x32xf32> to vector<8x32xbf16>
    %cst_70 = arith.constant dense<0.000000e+00> : vector<8x128xf32>
    %333 = tpu.matmul %332, %8, %cst_70 {dimension_numbers = #tpu.dot_dimension_numbers<[1], [0], [0], [1], [0, 0, 1, 1], [], []>} : vector<8x32xbf16>, vector<32x128xbf16>, vector<8x128xf32> -> vector<8x128xf32>
    %334 = arith.addf %333, %310 : vector<8x128xf32>
    %335 = arith.negf %334 : vector<8x128xf32>
    %336 = math.exp %335 : vector<8x128xf32>
    %cst_71 = arith.constant 1.000000e+00 : f32
    %337 = vector.broadcast %cst_71 : f32 to vector<8x128xf32>
    %338 = arith.addf %337, %336 : vector<8x128xf32>
    %339 = arith.divf %337, %338 : vector<8x128xf32>
    %340 = math.tanh %334 : vector<8x128xf32>
    %341 = vector.extract_strided_slice %339 {offsets = [0, 0], sizes = [8, 32], strides = [1, 1]} : vector<8x128xf32> to vector<8x32xf32>
    %342 = vector.extract_strided_slice %339 {offsets = [0, 32], sizes = [8, 32], strides = [1, 1]} : vector<8x128xf32> to vector<8x32xf32>
    %343 = vector.extract_strided_slice %340 {offsets = [0, 64], sizes = [8, 32], strides = [1, 1]} : vector<8x128xf32> to vector<8x32xf32>
    %344 = vector.extract_strided_slice %339 {offsets = [0, 96], sizes = [8, 32], strides = [1, 1]} : vector<8x128xf32> to vector<8x32xf32>
    %345 = arith.mulf %342, %305 : vector<8x32xf32>
    %346 = arith.mulf %341, %343 : vector<8x32xf32>
    %347 = arith.addf %345, %346 : vector<8x32xf32>
    %348 = math.tanh %347 : vector<8x32xf32>
    %349 = arith.mulf %344, %348 : vector<8x32xf32>
    %350 = arith.truncf %349 : vector<8x32xf32> to vector<8x32xbf16>
    %c8_i32_72 = arith.constant 8 : i32
    %c0_73 = arith.constant 0 : index
    %c0_74 = arith.constant 0 : index
    %351 = vector.load %arg7[%c0_73, %c0_74] : memref<32x128xbf16, #tpu.memory_space<vmem>>, vector<32x128xbf16>
    %cst_75 = arith.constant dense<0.000000e+00> : vector<8x128xf32>
    %352 = tpu.matmul %350, %351, %cst_75 {dimension_numbers = #tpu.dot_dimension_numbers<[1], [0], [0], [1], [0, 0, 1, 1], [], []>} : vector<8x32xbf16>, vector<32x128xbf16>, vector<8x128xf32> -> vector<8x128xf32>
    %c0_76 = arith.constant 0 : index
    %c0_77 = arith.constant 0 : index
    %353 = vector.load %arg8[%c0_76, %c0_77] : memref<1x128xf32, #tpu.memory_space<vmem>>, vector<1x128xf32>
    %354 = vector.broadcast %353 : vector<1x128xf32> to vector<8x128xf32>
    %355 = arith.addf %352, %354 : vector<8x128xf32>
    %356 = arith.negf %355 : vector<8x128xf32>
    %357 = math.exp %356 : vector<8x128xf32>
    %cst_78 = arith.constant 1.000000e+00 : f32
    %358 = vector.broadcast %cst_78 : f32 to vector<8x128xf32>
    %359 = arith.addf %358, %357 : vector<8x128xf32>
    %360 = arith.divf %358, %359 : vector<8x128xf32>
    %c0_79 = arith.constant 0 : index
    %c0_80 = arith.constant 0 : index
    %361 = vector.load %arg9[%c0_79, %c0_80] : memref<8x128xf32, #tpu.memory_space<vmem>>, vector<8x128xf32>
    tpu.vector_store %arg9[%c0_79, %c0_80], %360 {strides = array<i32>} : memref<8x128xf32, #tpu.memory_space<vmem>>, vector<8x128xf32>,
    return
  }
}

</mosaic_0001>

<bundles_post_ra>
// kernel: lstm_pallas.1
= control target key start
LH: loop header
LB: loop body
LE: loop exit
PB: predicated region body
PF: predicated region fallthrough
CT: control target
= control target key end

     0   :  { %vm73_vm0 = vcmask 130048   ;;  %v1524_v4 = vmov 0   ;;  %s1526_s18 = smov 32   ;;  %vm151_vm5 = vcmask 261120   ;;  %s1869_s1 = inlined_call_operand.vmem [shape: bf16[16,128], index: 1, kind: input, shape index: {}]   ;;  %s1870_s2 = inlined_call_operand.vmem [shape: bf16[32,128], index: 2, kind: input, shape index: {}]   ;;  %s1871_s0 = inlined_call_operand.vmem [shape: bf16[64,16], index: 0, kind: input, shape index: {}]   ;;  %s1872_s3 = inlined_call_operand.vmem [shape: f32[1,128], index: 3, kind: input, shape index: {}]   ;;  %s1873_s4 = inlined_call_operand.vmem [shape: bf16[32,128], index: 4, kind: input, shape index: {}]   ;;  %s1874_s5 = inlined_call_operand.vmem [shape: bf16[32,128], index: 5, kind: input, shape index: {}]   ;;  %s1875_s6 = inlined_call_operand.vmem [shape: f32[1,128], index: 6, kind: input, shape index: {}]   ;;  %s1876_s7 = inlined_call_operand.vmem [shape: bf16[32,128], index: 7, kind: input, shape index: {}]   ;;  %s1877_s8 = inlined_call_operand.vmem [shape: f32[1,128], index: 8, kind: input, shape index: {}]   ;;  %s1878_s9 = inlined_call_operand.vmem [shape: f32[8,128], index: 9, kind: output, shape index: {}]  }
   0x1   :  { %v1375_v0 = vld [vmem:[%s1869_s1] sm:$0xff]  ;;  %v1583_v1 = vld [vmem:[%s1870_s2 + $0x8] sm:$0xff] }
   0x2   :  { %v1371_v2 = vld [vmem:[%s1871_s0] sm:$0xff]  ;;  %93 = vmatpush.bf16.msra.mxu0 %v1375_v0  ;;  %187 = vmatpush.bf16.msra.mxu2 %v1583_v1  ;;  %v1616_v31 = vld [vmem:[%s1873_s4 + $0x8] sm:$0xff] }
   0x3   :  { %v1592_v3 = vld [vmem:[%s1870_s2] sm:$0xff]  ;;  %s1525_s2 = smov 64   ;;  %v1621_v32 = vld [vmem:[%s1874_s5 + $0x8] sm:$0xff]  ;;  %257 = vmatpush.bf16.msra.mxu3 %v1616_v31 }
   0x4   :  { %v1604_v5 = vld [vmem:[%s1872_s3] ss:$0 sm:$0xff]  ;;  %161 = vmatpush.bf16.msra.mxu1 %v1621_v32 }
   0x5   :  { %1295 = vmatmul.msk.bf16.vlgmr.msra.gmra.mxu0 %vm73_vm0, %v1371_v2  ;;  %v1628_v33 = vld [vmem:[%s1873_s4] sm:$0xff] }
   0x6   :  { %188 = vmatpush.bf16.msra.mxu2 %v1592_v3  ;;  %704 = vmatpush.bf16.msrb.mxu0 %v1621_v32  ;;  %v1638_v37 = vld [vmem:[%s1874_s5] sm:$0xff] }
   0x7   :  { %258 = vmatpush.bf16.msra.mxu3 %v1628_v33  ;;  %v1659_v43 = vld [vmem:[%s1875_s6] ss:$0 sm:$0xff] }
   0x8   :  { %162 = vmatpush.bf16.msra.mxu1 %v1638_v37 }
   0x9   :  { %189 = vmatmul.bf16.vlgmr.msra.gmra.mxu2 %v1524_v4 }
   0xa   :  { %329 = vmatpush.bf16.msrb.mxu2 %v1583_v1  ;;  %705 = vmatpush.bf16.msrb.mxu0 %v1638_v37 }
   0xb   :  { %387 = vmatpush.bf16.msrb.mxu3 %v1616_v31  ;;  %163 = vmatmul.bf16.vlgmr.msra.gmra.mxu1 %v1524_v4 }
   0xc   :  { %314 = vmatpush.bf16.msrb.mxu1 %v1621_v32 }
   0xe   :  { %330 = vmatpush.bf16.msrb.mxu2 %v1592_v3  ;;  %849 = vmatpush.bf16.msra.mxu0 %v1583_v1 }
   0xf   :  { %388 = vmatpush.bf16.msrb.mxu3 %v1628_v33 }
  0x10   :  { %315 = vmatpush.bf16.msrb.mxu1 %v1638_v37 }
  0x12   :  { %459 = vmatpush.bf16.msra.mxu2 %v1583_v1  ;;  %850 = vmatpush.bf16.msra.mxu0 %v1592_v3 }
  0x14   :  { %444 = vmatpush.bf16.msra.mxu1 %v1621_v32 }
  0x16   :  { %460 = vmatpush.bf16.msra.mxu2 %v1592_v3 }
  0x18   :  { %445 = vmatpush.bf16.msra.mxu1 %v1638_v37 }
  0x82   :  { %v95_v6 = vpop.f32.mrf.mxu0 }
  0x83   :  { %v96_v7 = vadd.f32 %v1604_v5, %v95_v6 }
  0x88   :  { %v164_v39 = vpop.f32.mrf.mxu1 }
  0x89   :  { %v165_v47 = vadd.f32 %v1659_v43, %v164_v39 }
  0x8a   :  { %v97_v41 = vpop.f32.mrf.mxu0 }
  0x8b   :  { %v98_v42 = vadd.f32 %v1604_v5, %v97_v41 }
  0x8c   :  { %v190_v8 = vpop.f32.mrf.mxu2 }
  0x8d   :  { %v194_v9 = vadd.f32 %v190_v8, %v96_v7 }
  0x8f   :  { %1390 = vtanh.f32 %v194_v9  ;;  %v1315_v12 = vmul.f32 -1.442695, %v194_v9 }
  0x90   :  { %v166_v40 = vpop.f32.mrf.mxu1 }
  0x91   :  { %1392 = vpow2.f32 %v1315_v12 }
  0x94   :  { %v192_v10 = vpop.f32.mrf.mxu2 }
  0x95   :  { %v1391_v11 = vpop.eup %1390 }
  0x96   :  { %217 = vrot.lane.b32.xlu0 %v1391_v11, %s1525_s2 }
  0x97   :  { %v1393_v13 = vpop.eup %1392 }
  0x98   :  { %v198_v14 = vadd.f32 1.0, %v1393_v13 }
  0x9a   :  { %1394 = vrcp.f32 %v198_v14  ;;  %v210_v20 = vand.u32 2147483648, %v198_v14  ;;  %vm204_vm2 = vweird.f32 %v198_v14  ;;  %v208_v21 = vand.u32 2147483647, %v198_v14 }
  0x9c   :  { %v211_v23 = vor.u32 1.1754944e-38, %v210_v20  ;;  %vm209_vm4 = vcmp.eq.f32.partialorder %v208_v21, 8.507059e+37 }
  0xa0   :  { %v1395_v15 = vpop.eup %1394 }
  0xa1   :  { %v200_v16 = vmul.f32 %v1395_v15, %v198_v14  ;;  %vm205_vm1 = vweird.f32 %v1395_v15 }
  0xa2   :  { %vm206_vm3 = vmor %vm204_vm2, %vm205_vm1 }
  0xa3   :  { %v201_v17 = vsub.f32 1.0, %v200_v16 }
  0xa5   :  { %v202_v18 = vmul.f32 %v1395_v15, %v201_v17 }
  0xa7   :  { %v203_v19 = vadd.f32 %v1395_v15, %v202_v18 }
  0xa9   :  { %v207_v22 = vsel %vm206_vm3, %v1395_v15, %v203_v19 }
  0xaa   :  { %v212_v25 = vsel %vm209_vm4, %v211_v23, %v207_v22 }
  0xab   :  { %v215_v27 = vmul.f32 0.0, %v212_v25 }
 0x108   :  { %v218_v24 = vpop.permute.xlu0 %217 }
 0x109   :  { %v220_v26 = vmul.f32 %v218_v24, %v212_v25 }
 0x10b   :  { %222 = vrot.lane.b32.xlu0 %v220_v26, %s1526_s18 }
 0x17d   :  { %v223_v28 = vpop.permute.xlu0 %222 }
 0x17e   :  { %v1609_v29 = vadd.f32 %v223_v28, %v215_v27 }
 0x180   :  { %1396 = vtanh.f32 %v1609_v29 }
 0x186   :  { %v1397_v30 = vpop.eup %1396 }
 0x187   :  { %228 = vrot.lane.b32.xlu1 %v1397_v30, %s1525_s2 }
 0x1f9   :  { %v229_v34 = vpop.permute.xlu1 %228 }
 0x1fa   :  { %v231_v35 = vmul.f32 %v229_v34, %v212_v25 }
 0x1fc   :  { %v232_v36 = vpack.c.bf16 %v231_v35, %v231_v35 }
 0x1fe   :  { %234 = vrot.lane.b32.xlu1 %v232_v36, %s1526_s18  ;;  %v1372_v36 = vld [vmem:[%s1871_s0 + $0x8] sm:$0xff] }
 0x1ff   :  { %1296 = vmatmul.msk.bf16.gmra.mxu0 %vm73_vm0, %v1372_v36 }
 0x270   :  { %v235_v38 = vpop.permute.xlu1 %234 }
 0x271   :  { %1324 = vmatmul.msk.bf16.vlgmr.msra.gmra.mxu3 %vm151_vm5, %v235_v38  ;;  %1327 = vmatmul.msk.bf16.vlgmr.msrb.gmra.mxu2 %vm151_vm5, %v235_v38 }
 0x272   :  { %589 = vmatpush.bf16.msrb.mxu2 %v1583_v1  ;;  %517 = vmatpush.bf16.msra.mxu3 %v1616_v31 }
 0x276   :  { %590 = vmatpush.bf16.msrb.mxu2 %v1592_v3  ;;  %518 = vmatpush.bf16.msra.mxu3 %v1628_v33 }
 0x2f4   :  { %v260_v44 = vpop.f32.mrf.mxu3  ;;  %v332_v45 = vpop.f32.mrf.mxu2 }
 0x2f5   :  { %v336_v46 = vadd.f32 %v332_v45, %v98_v42  ;;  %v261_v48 = vadd.f32 %v260_v44, %v165_v47  ;;  %v100_v44 = vpop.f32.mrf.mxu0 }
 0x2f6   :  { %v101_v45 = vadd.f32 %v1604_v5, %v100_v44 }
 0x2f7   :  { %1398 = vtanh.f32 %v336_v46  ;;  %v1328_v53 = vmul.f32 -1.442695, %v336_v46  ;;  %v1325_v54 = vmul.f32 -1.442695, %v261_v48 }
 0x2f8   :  { %1400 = vtanh.f32 %v261_v48 }
 0x2f9   :  { %1402 = vpow2.f32 %v1328_v53 }
 0x2fa   :  { %1404 = vpow2.f32 %v1325_v54 }
 0x2fc   :  { %v262_v49 = vpop.f32.mrf.mxu3  ;;  %v334_v50 = vpop.f32.mrf.mxu2 }
 0x2fd   :  { %v1399_v51 = vpop.eup %1398 }
 0x2fe   :  { %359 = vrot.lane.b32.xlu2 %v1399_v51, %s1525_s2  ;;  %v1401_v52 = vpop.eup %1400 }
 0x2ff   :  { %v1403_v55 = vpop.eup %1402 }
 0x300   :  { %v340_v56 = vadd.f32 1.0, %v1403_v55  ;;  %v1405_v57 = vpop.eup %1404 }
 0x301   :  { %v267_v58 = vadd.f32 1.0, %v1405_v57 }
 0x302   :  { %1406 = vrcp.f32 %v340_v56  ;;  %v352_v6 = vand.u32 2147483648, %v340_v56  ;;  %vm346_vm7 = vweird.f32 %v340_v56  ;;  %v350_v7 = vand.u32 2147483647, %v340_v56 }
 0x303   :  { %1408 = vrcp.f32 %v267_v58  ;;  %v279_v15 = vand.u32 2147483648, %v267_v58  ;;  %vm273_vm11 = vweird.f32 %v267_v58  ;;  %v277_v16 = vand.u32 2147483647, %v267_v58 }
 0x304   :  { %v353_v10 = vor.u32 1.1754944e-38, %v352_v6  ;;  %vm351_vm9 = vcmp.eq.f32.partialorder %v350_v7, 8.507059e+37 }
 0x305   :  { %v280_v18 = vor.u32 1.1754944e-38, %v279_v15  ;;  %vm278_vm13 = vcmp.eq.f32.partialorder %v277_v16, 8.507059e+37 }
 0x306   :  { %286 = vrot.lane.b32.xlu2 %v1401_v52, %s1525_s2 }
 0x308   :  { %v1407_v59 = vpop.eup %1406 }
 0x309   :  { %v342_v60 = vmul.f32 %v1407_v59, %v340_v56  ;;  %v1409_v62 = vpop.eup %1408  ;;  %vm347_vm6 = vweird.f32 %v1407_v59 }
 0x30a   :  { %v269_v0 = vmul.f32 %v1409_v62, %v267_v58  ;;  %vm348_vm8 = vmor %vm346_vm7, %vm347_vm6  ;;  %vm274_vm10 = vweird.f32 %v1409_v62 }
 0x30b   :  { %v343_v61 = vsub.f32 1.0, %v342_v60  ;;  %vm275_vm12 = vmor %vm273_vm11, %vm274_vm10 }
 0x30c   :  { %v270_v4 = vsub.f32 1.0, %v269_v0 }
 0x30d   :  { %v344_v63 = vmul.f32 %v1407_v59, %v343_v61 }
 0x30e   :  { %v271_v9 = vmul.f32 %v1409_v62, %v270_v4 }
 0x30f   :  { %v345_v2 = vadd.f32 %v1407_v59, %v344_v63 }
 0x310   :  { %v272_v14 = vadd.f32 %v1409_v62, %v271_v9 }
 0x311   :  { %v349_v8 = vsel %vm348_vm8, %v1407_v59, %v345_v2 }
 0x312   :  { %v354_v12 = vsel %vm351_vm9, %v353_v10, %v349_v8  ;;  %v276_v17 = vsel %vm275_vm12, %v1409_v62, %v272_v14 }
 0x313   :  { %v281_v20 = vsel %vm278_vm13, %v280_v18, %v276_v17  ;;  %v357_v22 = vmul.f32 %v354_v12, %v1609_v29 }
 0x314   :  { %v284_v25 = vmul.f32 0.0, %v281_v20 }
 0x358   :  { %v360_v11 = vpop.permute.xlu2 %359 }
 0x359   :  { %v362_v13 = vmul.f32 %v360_v11, %v354_v12 }
 0x35b   :  { %364 = vrot.lane.b32.xlu0 %v362_v13, %s1526_s18 }
 0x360   :  { %v287_v19 = vpop.permute.xlu2 %286 }
 0x361   :  { %v289_v21 = vmul.f32 %v287_v19, %v281_v20 }
 0x363   :  { %291 = vrot.lane.b32.xlu1 %v289_v21, %s1526_s18 }
 0x3cd   :  { %v365_v23 = vpop.permute.xlu0 %364 }
 0x3ce   :  { %v1667_v24 = vadd.f32 %v365_v23, %v357_v22 }
 0x3d0   :  { %1410 = vtanh.f32 %v1667_v24 }
 0x3d5   :  { %v292_v26 = vpop.permute.xlu1 %291 }
 0x3d6   :  { %v1411_v27 = vpop.eup %1410  ;;  %v1670_v28 = vadd.f32 %v292_v26, %v284_v25 }
 0x3d7   :  { %370 = vrot.lane.b32.xlu2 %v1411_v27, %s1525_s2 }
 0x3d8   :  { %1412 = vtanh.f32 %v1670_v28 }
 0x3de   :  { %v1413_v30 = vpop.eup %1412 }
 0x3df   :  { %297 = vrot.lane.b32.xlu0 %v1413_v30, %s1525_s2 }
 0x431   :  { %v371_v34 = vpop.permute.xlu2 %370 }
 0x432   :  { %v373_v35 = vmul.f32 %v371_v34, %v354_v12 }
 0x434   :  { %v374_v29 = vpack.c.bf16 %v373_v35, %v373_v35 }
 0x436   :  { %376 = vrot.lane.b32.xlu1 %v374_v29, %s1526_s18 }
 0x451   :  { %v298_v38 = vpop.permute.xlu0 %297 }
 0x452   :  { %v300_v39 = vmul.f32 %v298_v38, %v281_v20 }
 0x454   :  { %v301_v40 = vpack.c.bf16 %v300_v39, %v300_v39 }
 0x456   :  { %303 = vrot.lane.b32.xlu2 %v301_v40, %s1526_s18 }
 0x4a8   :  { %v377_v41 = vpop.permute.xlu1 %376 }
 0x4a9   :  { %1329 = vmatmul.msk.bf16.vlgmr.msrb.gmra.mxu3 %vm151_vm5, %v377_v41  ;;  %1332 = vmatmul.msk.bf16.vlgmr.msra.gmra.mxu2 %vm151_vm5, %v377_v41 }
 0x4aa   :  { %647 = vmatpush.bf16.msrb.mxu3 %v1616_v31  ;;  %777 = vmatpush.bf16.msra.mxu2 %v1616_v31 }
 0x4ae   :  { %648 = vmatpush.bf16.msrb.mxu3 %v1628_v33  ;;  %778 = vmatpush.bf16.msra.mxu2 %v1628_v33 }
 0x4b0   :  { %v304_v42 = vpop.permute.xlu2 %303 }
 0x4b1   :  { %1326 = vmatmul.msk.bf16.vlgmr.msrb.gmra.mxu1 %vm151_vm5, %v304_v42 }
 0x4b2   :  { %574 = vmatpush.bf16.msrb.mxu1 %v1621_v32 }
 0x4b6   :  { %575 = vmatpush.bf16.msrb.mxu1 %v1638_v37 }
 0x52c   :  { %v390_v46 = vpop.f32.mrf.mxu3  ;;  %v462_v47 = vpop.f32.mrf.mxu2 }
 0x52d   :  { %v466_v48 = vadd.f32 %v462_v47, %v101_v45  ;;  %v102_v47 = vpop.f32.mrf.mxu0 }
 0x52e   :  { %v317_v49 = vpop.f32.mrf.mxu1 }
 0x52f   :  { %1414 = vtanh.f32 %v466_v48  ;;  %v318_v50 = vadd.f32 %v1659_v43, %v317_v49  ;;  %v1333_v57 = vmul.f32 -1.442695, %v466_v48  ;;  %v103_v49 = vadd.f32 %v1604_v5, %v102_v47 }
 0x531   :  { %v391_v51 = vadd.f32 %v390_v46, %v318_v50 }
 0x533   :  { %1416 = vtanh.f32 %v391_v51  ;;  %v1330_v58 = vmul.f32 -1.442695, %v391_v51 }
 0x534   :  { %v392_v52 = vpop.f32.mrf.mxu3  ;;  %v464_v53 = vpop.f32.mrf.mxu2  ;;  %1418 = vpow2.f32 %v1333_v57 }
 0x535   :  { %v1415_v54 = vpop.eup %1414  ;;  %1420 = vpow2.f32 %v1330_v58 }
 0x536   :  { %489 = vrot.lane.b32.xlu0 %v1415_v54, %s1525_s2  ;;  %v319_v55 = vpop.f32.mrf.mxu1 }
 0x539   :  { %v1417_v56 = vpop.eup %1416 }
 0x53a   :  { %416 = vrot.lane.b32.xlu1 %v1417_v56, %s1525_s2  ;;  %v1419_v59 = vpop.eup %1418 }
 0x53b   :  { %v470_v60 = vadd.f32 1.0, %v1419_v59  ;;  %v1421_v61 = vpop.eup %1420 }
 0x53c   :  { %v397_v62 = vadd.f32 1.0, %v1421_v61 }
 0x53d   :  { %1422 = vrcp.f32 %v470_v60  ;;  %v482_v11 = vand.u32 2147483648, %v470_v60  ;;  %vm476_vm15 = vweird.f32 %v470_v60  ;;  %v480_v12 = vand.u32 2147483647, %v470_v60 }
 0x53e   :  { %1424 = vrcp.f32 %v397_v62  ;;  %v409_v16 = vand.u32 2147483648, %v397_v62  ;;  %vm403_vm4 = vweird.f32 %v397_v62  ;;  %v407_v17 = vand.u32 2147483647, %v397_v62 }
 0x53f   :  { %v483_v15 = vor.u32 1.1754944e-38, %v482_v11  ;;  %vm481_vm3 = vcmp.eq.f32.partialorder %v480_v12, 8.507059e+37 }
 0x540   :  { %v410_v22 = vor.u32 1.1754944e-38, %v409_v16  ;;  %vm408_vm7 = vcmp.eq.f32.partialorder %v407_v17, 8.507059e+37 }
 0x543   :  { %v1423_v63 = vpop.eup %1422 }
 0x544   :  { %v472_v0 = vmul.f32 %v1423_v63, %v470_v60  ;;  %v1425_v2 = vpop.eup %1424  ;;  %vm477_vm14 = vweird.f32 %v1423_v63 }
 0x545   :  { %v399_v6 = vmul.f32 %v1425_v2, %v397_v62  ;;  %vm478_vm1 = vmor %vm476_vm15, %vm477_vm14  ;;  %vm404_vm2 = vweird.f32 %v1425_v2 }
 0x546   :  { %v473_v4 = vsub.f32 1.0, %v472_v0  ;;  %vm405_vm6 = vmor %vm403_vm4, %vm404_vm2 }
 0x547   :  { %v400_v8 = vsub.f32 1.0, %v399_v6 }
 0x548   :  { %v474_v7 = vmul.f32 %v1423_v63, %v473_v4 }
 0x549   :  { %v401_v10 = vmul.f32 %v1425_v2, %v400_v8 }
 0x54a   :  { %v475_v9 = vadd.f32 %v1423_v63, %v474_v7 }
 0x54b   :  { %v402_v14 = vadd.f32 %v1425_v2, %v401_v10 }
 0x54c   :  { %v479_v13 = vsel %vm478_vm1, %v1423_v63, %v475_v9 }
 0x54d   :  { %v484_v18 = vsel %vm481_vm3, %v483_v15, %v479_v13  ;;  %v406_v21 = vsel %vm405_vm6, %v1425_v2, %v402_v14 }
 0x54e   :  { %v411_v25 = vsel %vm408_vm7, %v410_v22, %v406_v21  ;;  %v487_v27 = vmul.f32 %v484_v18, %v1667_v24 }
 0x54f   :  { %v414_v29 = vmul.f32 %v411_v25, %v1670_v28 }
 0x5a8   :  { %v490_v19 = vpop.permute.xlu0 %489 }
 0x5a9   :  { %v492_v20 = vmul.f32 %v490_v19, %v484_v18 }
 0x5ab   :  { %494 = vrot.lane.b32.xlu2 %v492_v20, %s1526_s18 }
 0x5ac   :  { %v417_v23 = vpop.permute.xlu1 %416 }
 0x5ad   :  { %v419_v26 = vmul.f32 %v417_v23, %v411_v25 }
 0x5af   :  { %421 = vrot.lane.b32.xlu0 %v419_v26, %s1526_s18 }
 0x605   :  { %v495_v30 = vpop.permute.xlu2 %494 }
 0x606   :  { %v1697_v34 = vadd.f32 %v495_v30, %v487_v27 }
 0x608   :  { %1426 = vtanh.f32 %v1697_v34 }
 0x60e   :  { %v1427_v35 = vpop.eup %1426 }
 0x60f   :  { %500 = vrot.lane.b32.xlu1 %v1427_v35, %s1525_s2 }
 0x621   :  { %v422_v36 = vpop.permute.xlu0 %421 }
 0x622   :  { %v1702_v38 = vadd.f32 %v422_v36, %v414_v29 }
 0x624   :  { %1428 = vtanh.f32 %v1702_v38 }
 0x62a   :  { %v1429_v39 = vpop.eup %1428 }
 0x62b   :  { %427 = vrot.lane.b32.xlu2 %v1429_v39, %s1525_s2 }
 0x681   :  { %v501_v40 = vpop.permute.xlu1 %500 }
 0x682   :  { %v503_v24 = vmul.f32 %v501_v40, %v484_v18 }
 0x684   :  { %v504_v41 = vpack.c.bf16 %v503_v24, %v503_v24 }
 0x685   :  { %v428_v42 = vpop.permute.xlu2 %427 }
 0x686   :  { %v430_v44 = vmul.f32 %v428_v42, %v411_v25  ;;  %506 = vrot.lane.b32.xlu0 %v504_v41, %s1526_s18 }
 0x688   :  { %v431_v45 = vpack.c.bf16 %v430_v44, %v430_v44 }
 0x68a   :  { %433 = vrot.lane.b32.xlu1 %v431_v45, %s1526_s18 }
 0x6f8   :  { %v507_v46 = vpop.permute.xlu0 %506 }
 0x6f9   :  { %1334 = vmatmul.msk.bf16.vlgmr.msra.gmra.mxu3 %vm151_vm5, %v507_v46  ;;  %1337 = vmatmul.msk.bf16.vlgmr.msrb.gmra.mxu2 %vm151_vm5, %v507_v46 }
 0x6fa   :  { %834 = vmatpush.bf16.msra.mxu3 %v1621_v32  ;;  %964 = vmatpush.bf16.msrb.mxu2 %v1621_v32 }
 0x6fc   :  { %v434_v28 = vpop.permute.xlu1 %433 }
 0x6fd   :  { %1331 = vmatmul.msk.bf16.vlgmr.msra.gmra.mxu1 %vm151_vm5, %v434_v28 }
 0x6fe   :  { %719 = vmatpush.bf16.msra.mxu1 %v1583_v1  ;;  %835 = vmatpush.bf16.msra.mxu3 %v1638_v37 }
 0x6ff   :  { %965 = vmatpush.bf16.msrb.mxu2 %v1638_v37 }
 0x702   :  { %720 = vmatpush.bf16.msra.mxu1 %v1592_v3 }
 0x77a   :  { %v447_v48 = vpop.f32.mrf.mxu1 }
 0x77b   :  { %v448_v50 = vadd.f32 %v1659_v43, %v447_v48  ;;  %v1373_v48 = vld [vmem:[%s1871_s0 + $0x10] sm:$0xff] }
 0x77c   :  { %v520_v51 = vpop.f32.mrf.mxu3  ;;  %v592_v52 = vpop.f32.mrf.mxu2  ;;  %1297 = vmatmul.msk.bf16.gmra.mxu0 %vm73_vm0, %v1373_v48 }
 0x77d   :  { %v521_v53 = vadd.f32 %v520_v51, %v448_v50  ;;  %v596_v54 = vadd.f32 %v592_v52, %v103_v49 }
 0x77f   :  { %1430 = vtanh.f32 %v521_v53  ;;  %v1335_v60 = vmul.f32 -1.442695, %v521_v53  ;;  %v1338_v0 = vmul.f32 -1.442695, %v596_v54 }
 0x780   :  { %1432 = vtanh.f32 %v596_v54 }
 0x781   :  { %1434 = vpow2.f32 %v1335_v60 }
 0x782   :  { %v449_v55 = vpop.f32.mrf.mxu1 }
 0x784   :  { %v522_v56 = vpop.f32.mrf.mxu3  ;;  %v594_v57 = vpop.f32.mrf.mxu2 }
 0x785   :  { %v1431_v58 = vpop.eup %1430 }
 0x786   :  { %v1433_v59 = vpop.eup %1432  ;;  %546 = vrot.lane.b32.xlu2 %v1431_v58, %s1525_s2 }
 0x787   :  { %619 = vrot.lane.b32.xlu0 %v1433_v59, %s1525_s2  ;;  %v1435_v61 = vpop.eup %1434 }
 0x788   :  { %v527_v62 = vadd.f32 1.0, %v1435_v61 }
 0x78a   :  { %1436 = vrcp.f32 %v527_v62  ;;  %v539_v10 = vand.u32 2147483648, %v527_v62  ;;  %vm533_vm9 = vweird.f32 %v527_v62  ;;  %v537_v11 = vand.u32 2147483647, %v527_v62 }
 0x78b   :  { %1438 = vpow2.f32 %v1338_v0 }
 0x78c   :  { %v540_v13 = vor.u32 1.1754944e-38, %v539_v10  ;;  %vm538_vm11 = vcmp.eq.f32.partialorder %v537_v11, 8.507059e+37 }
 0x790   :  { %v1437_v63 = vpop.eup %1436 }
 0x791   :  { %v529_v2 = vmul.f32 %v1437_v63, %v527_v62  ;;  %v1439_v7 = vpop.eup %1438  ;;  %vm534_vm8 = vweird.f32 %v1437_v63 }
 0x792   :  { %v600_v8 = vadd.f32 1.0, %v1439_v7  ;;  %vm535_vm10 = vmor %vm533_vm9, %vm534_vm8 }
 0x793   :  { %v530_v4 = vsub.f32 1.0, %v529_v2 }
 0x794   :  { %1440 = vrcp.f32 %v600_v8  ;;  %v612_v22 = vand.u32 2147483648, %v600_v8  ;;  %vm606_vm13 = vweird.f32 %v600_v8  ;;  %v610_v23 = vand.u32 2147483647, %v600_v8 }
 0x795   :  { %v531_v6 = vmul.f32 %v1437_v63, %v530_v4 }
 0x796   :  { %v613_v26 = vor.u32 1.1754944e-38, %v612_v22  ;;  %vm611_vm15 = vcmp.eq.f32.partialorder %v610_v23, 8.507059e+37 }
 0x797   :  { %v532_v9 = vadd.f32 %v1437_v63, %v531_v6 }
 0x799   :  { %v536_v12 = vsel %vm535_vm10, %v1437_v63, %v532_v9 }
 0x79a   :  { %v541_v15 = vsel %vm538_vm11, %v540_v13, %v536_v12  ;;  %v1441_v17 = vpop.eup %1440 }
 0x79b   :  { %v602_v18 = vmul.f32 %v1441_v17, %v600_v8  ;;  %vm607_vm12 = vweird.f32 %v1441_v17  ;;  %v544_v29 = vmul.f32 %v541_v15, %v1702_v38 }
 0x79c   :  { %vm608_vm14 = vmor %vm606_vm13, %vm607_vm12 }
 0x79d   :  { %v603_v19 = vsub.f32 1.0, %v602_v18 }
 0x79f   :  { %v604_v20 = vmul.f32 %v1441_v17, %v603_v19 }
 0x7a1   :  { %v605_v21 = vadd.f32 %v1441_v17, %v604_v20 }
 0x7a3   :  { %v609_v25 = vsel %vm608_vm14, %v1441_v17, %v605_v21 }
 0x7a4   :  { %v614_v30 = vsel %vm611_vm15, %v613_v26, %v609_v25 }
 0x7a5   :  { %v617_v36 = vmul.f32 %v614_v30, %v1697_v34 }
 0x7e0   :  { %v547_v14 = vpop.permute.xlu2 %546 }
 0x7e1   :  { %v549_v16 = vmul.f32 %v547_v14, %v541_v15 }
 0x7e3   :  { %551 = vrot.lane.b32.xlu1 %v549_v16, %s1526_s18 }
 0x7f9   :  { %v620_v27 = vpop.permute.xlu0 %619  ;;  %v105_v53 = vpop.f32.mrf.mxu0 }
 0x7fa   :  { %v622_v35 = vmul.f32 %v620_v27, %v614_v30  ;;  %v106_v54 = vadd.f32 %v1604_v5, %v105_v53 }
 0x7fc   :  { %624 = vrot.lane.b32.xlu2 %v622_v35, %s1526_s18 }
 0x801   :  { %v107_v53 = vpop.f32.mrf.mxu0 }
 0x855   :  { %v552_v39 = vpop.permute.xlu1 %551 }
 0x856   :  { %v625_v40 = vpop.permute.xlu2 %624  ;;  %v1725_v24 = vadd.f32 %v552_v39, %v544_v29 }
 0x857   :  { %v1727_v41 = vadd.f32 %v625_v40, %v617_v36 }
 0x858   :  { %1442 = vtanh.f32 %v1725_v24 }
 0x859   :  { %1444 = vtanh.f32 %v1727_v41 }
 0x85e   :  { %v1443_v42 = vpop.eup %1442 }
 0x85f   :  { %v1445_v44 = vpop.eup %1444  ;;  %557 = vrot.lane.b32.xlu0 %v1443_v42, %s1525_s2 }
 0x860   :  { %630 = vrot.lane.b32.xlu1 %v1445_v44, %s1525_s2 }
 0x8d1   :  { %v558_v45 = vpop.permute.xlu0 %557 }
 0x8d2   :  { %v631_v38 = vpop.permute.xlu1 %630  ;;  %v560_v46 = vmul.f32 %v558_v45, %v541_v15 }
 0x8d3   :  { %v633_v34 = vmul.f32 %v631_v38, %v614_v30 }
 0x8d4   :  { %v561_v28 = vpack.c.bf16 %v560_v46, %v560_v46 }
 0x8d5   :  { %v634_v47 = vpack.c.bf16 %v633_v34, %v633_v34 }
 0x8d6   :  { %563 = vrot.lane.b32.xlu2 %v561_v28, %s1526_s18 }
 0x8d7   :  { %636 = vrot.lane.b32.xlu0 %v634_v47, %s1526_s18 }
 0x930   :  { %v564_v49 = vpop.permute.xlu2 %563 }
 0x931   :  { %1336 = vmatmul.msk.bf16.vlgmr.msrb.gmra.mxu1 %vm151_vm5, %v564_v49 }
 0x932   :  { %907 = vmatpush.bf16.msrb.mxu1 %v1616_v31 }
 0x936   :  { %908 = vmatpush.bf16.msrb.mxu1 %v1628_v33 }
 0x949   :  { %v637_v50 = vpop.permute.xlu0 %636 }
 0x94a   :  { %1339 = vmatmul.msk.bf16.vlgmr.msrb.gmra.mxu3 %vm151_vm5, %v637_v50  ;;  %1342 = vmatmul.msk.bf16.vlgmr.msra.gmra.mxu1 %vm151_vm5, %v637_v50 }
 0x94b   :  { %979 = vmatpush.bf16.msrb.mxu3 %v1583_v1  ;;  %1094 = vmatpush.bf16.msra.mxu1 %v1621_v32 }
 0x94f   :  { %980 = vmatpush.bf16.msrb.mxu3 %v1592_v3  ;;  %1095 = vmatpush.bf16.msra.mxu1 %v1638_v37 }
 0x9ae   :  { %v577_v51 = vpop.f32.mrf.mxu1 }
 0x9af   :  { %v578_v57 = vadd.f32 %v1659_v43, %v577_v51 }
 0x9b6   :  { %v579_v52 = vpop.f32.mrf.mxu1 }
 0x9c7   :  { %v722_v55 = vpop.f32.mrf.mxu1 }
 0x9c8   :  { %v726_v56 = vadd.f32 %v722_v55, %v106_v54 }
 0x9ca   :  { %1446 = vtanh.f32 %v726_v56  ;;  %v1343_v37 = vmul.f32 -1.442695, %v726_v56 }
 0x9cd   :  { %v650_v58 = vpop.f32.mrf.mxu3 }
 0x9ce   :  { %v651_v59 = vadd.f32 %v650_v58, %v578_v57 }
 0x9cf   :  { %v724_v60 = vpop.f32.mrf.mxu1 }
 0x9d0   :  { %v1447_v61 = vpop.eup %1446  ;;  %1448 = vtanh.f32 %v651_v59  ;;  %v1340_v6 = vmul.f32 -1.442695, %v651_v59 }
 0x9d1   :  { %749 = vrot.lane.b32.xlu2 %v1447_v61, %s1525_s2  ;;  %1450 = vpow2.f32 %v1343_v37  ;;  %v108_v61 = vadd.f32 %v1604_v5, %v107_v53 }
 0x9d5   :  { %v652_v32 = vpop.f32.mrf.mxu3 }
 0x9d6   :  { %v1449_v62 = vpop.eup %1448 }
 0x9d7   :  { %676 = vrot.lane.b32.xlu1 %v1449_v62, %s1525_s2  ;;  %v1451_v63 = vpop.eup %1450 }
 0x9d8   :  { %v730_v0 = vadd.f32 1.0, %v1451_v63 }
 0x9da   :  { %1452 = vrcp.f32 %v730_v0  ;;  %v742_v10 = vand.u32 2147483648, %v730_v0  ;;  %vm736_vm2 = vweird.f32 %v730_v0  ;;  %v740_v12 = vand.u32 2147483647, %v730_v0 }
 0x9db   :  { %1454 = vpow2.f32 %v1340_v6 }
 0x9dc   :  { %v743_v15 = vor.u32 1.1754944e-38, %v742_v10  ;;  %vm741_vm4 = vcmp.eq.f32.partialorder %v740_v12, 8.507059e+37 }
 0x9e0   :  { %v1453_v2 = vpop.eup %1452 }
 0x9e1   :  { %v732_v4 = vmul.f32 %v1453_v2, %v730_v0  ;;  %vm737_vm1 = vweird.f32 %v1453_v2  ;;  %v1455_v11 = vpop.eup %1454 }
 0x9e2   :  { %vm738_vm3 = vmor %vm736_vm2, %vm737_vm1  ;;  %v657_v14 = vadd.f32 1.0, %v1455_v11 }
 0x9e3   :  { %v733_v7 = vsub.f32 1.0, %v732_v4 }
 0x9e4   :  { %1456 = vrcp.f32 %v657_v14  ;;  %v669_v25 = vand.u32 2147483648, %v657_v14  ;;  %vm663_vm7 = vweird.f32 %v657_v14  ;;  %v667_v26 = vand.u32 2147483647, %v657_v14 }
 0x9e5   :  { %v734_v8 = vmul.f32 %v1453_v2, %v733_v7 }
 0x9e6   :  { %v670_v30 = vor.u32 1.1754944e-38, %v669_v25  ;;  %vm668_vm9 = vcmp.eq.f32.partialorder %v667_v26, 8.507059e+37 }
 0x9e7   :  { %v735_v9 = vadd.f32 %v1453_v2, %v734_v8 }
 0x9e9   :  { %v739_v13 = vsel %vm738_vm3, %v1453_v2, %v735_v9 }
 0x9ea   :  { %v744_v17 = vsel %vm741_vm4, %v743_v15, %v739_v13  ;;  %v1457_v19 = vpop.eup %1456 }
 0x9eb   :  { %v659_v20 = vmul.f32 %v1457_v19, %v657_v14  ;;  %vm664_vm6 = vweird.f32 %v1457_v19  ;;  %v747_v39 = vmul.f32 %v744_v17, %v1727_v41 }
 0x9ec   :  { %vm665_vm8 = vmor %vm663_vm7, %vm664_vm6 }
 0x9ed   :  { %v660_v21 = vsub.f32 1.0, %v659_v20 }
 0x9ef   :  { %v661_v22 = vmul.f32 %v1457_v19, %v660_v21 }
 0x9f1   :  { %v662_v23 = vadd.f32 %v1457_v19, %v661_v22 }
 0x9f3   :  { %v666_v27 = vsel %vm665_vm8, %v1457_v19, %v662_v23 }
 0x9f4   :  { %v671_v29 = vsel %vm668_vm9, %v670_v30, %v666_v27 }
 0x9f5   :  { %v674_v45 = vmul.f32 %v671_v29, %v1725_v24  ;;  %v1374_v24 = vld [vmem:[%s1871_s0 + $0x18] sm:$0xff] }
 0x9f6   :  { %1298 = vmatmul.msk.bf16.gmra.mxu0 %vm73_vm0, %v1374_v24 }
 0xa2b   :  { %v750_v16 = vpop.permute.xlu2 %749 }
 0xa2c   :  { %v752_v18 = vmul.f32 %v750_v16, %v744_v17 }
 0xa2e   :  { %754 = vrot.lane.b32.xlu1 %v752_v18, %s1526_s18 }
 0xa49   :  { %v677_v35 = vpop.permute.xlu1 %676 }
 0xa4a   :  { %v679_v36 = vmul.f32 %v677_v35, %v671_v29 }
 0xa4c   :  { %681 = vrot.lane.b32.xlu0 %v679_v36, %s1526_s18 }
 0xa73   :  { %v1777_v55 = vpop.f32.mrf.mxu0 }
 0xa7b   :  { %v1779_v57 = vpop.f32.mrf.mxu0 }
 0xaa0   :  { %v755_v40 = vpop.permute.xlu1 %754 }
 0xaa1   :  { %v1755_v42 = vadd.f32 %v755_v40, %v747_v39 }
 0xaa3   :  { %1458 = vtanh.f32 %v1755_v42 }
 0xaa9   :  { %v1459_v44 = vpop.eup %1458 }
 0xaaa   :  { %760 = vrot.lane.b32.xlu0 %v1459_v44, %s1525_s2 }
 0xabe   :  { %v682_v38 = vpop.permute.xlu0 %681 }
 0xabf   :  { %v1760_v46 = vadd.f32 %v682_v38, %v674_v45 }
 0xac1   :  { %1460 = vtanh.f32 %v1760_v46 }
 0xac7   :  { %v1461_v34 = vpop.eup %1460 }
 0xac8   :  { %687 = vrot.lane.b32.xlu2 %v1461_v34, %s1525_s2 }
 0xb1c   :  { %v761_v28 = vpop.permute.xlu0 %760 }
 0xb1d   :  { %v763_v41 = vmul.f32 %v761_v28, %v744_v17 }
 0xb1f   :  { %v764_v47 = vpack.c.bf16 %v763_v41, %v763_v41 }
 0xb21   :  { %766 = vrot.lane.b32.xlu2 %v764_v47, %s1526_s18 }
 0xb22   :  { %v688_v48 = vpop.permute.xlu2 %687 }
 0xb23   :  { %v690_v49 = vmul.f32 %v688_v48, %v671_v29 }
 0xb25   :  { %v691_v50 = vpack.c.bf16 %v690_v49, %v690_v49 }
 0xb27   :  { %693 = vrot.lane.b32.xlu1 %v691_v50, %s1526_s18 }
 0xb7b   :  { %v767_v51 = vpop.permute.xlu2 %766 }
 0xb7c   :  { %1344 = vmatmul.msk.bf16.vlgmr.msra.gmra.mxu2 %vm151_vm5, %v767_v51 }
 0xb7d   :  { %1109 = vmatpush.bf16.msra.mxu2 %v1583_v1 }
 0xb81   :  { %1110 = vmatpush.bf16.msra.mxu2 %v1592_v3 }
 0xb99   :  { %v694_v52 = vpop.permute.xlu1 %693 }
 0xb9a   :  { %1341 = vmatmul.msk.bf16.vlgmr.msrb.gmra.mxu0 %vm151_vm5, %v694_v52 }
 0xb9b   :  { %1037 = vmatpush.bf16.msrb.mxu0 %v1616_v31 }
 0xb9f   :  { %1038 = vmatpush.bf16.msrb.mxu0 %v1628_v33 }
 0xbaa   :  { %1347 = vmatmul.msk.bf16.vlgmr.msra.gmra.mxu0 %vm151_vm5, %v767_v51 }
 0xbff   :  { %v780_v54 = vpop.f32.mrf.mxu2 }
 0xc07   :  { %v782_v56 = vpop.f32.mrf.mxu2 }
 0xc17   :  { %v707_v58 = vpop.f32.mrf.mxu0 }
 0xc18   :  { %v708_v1 = vadd.f32 %v1659_v43, %v707_v58 }
 0xc1a   :  { %v781_v3 = vadd.f32 %v780_v54, %v708_v1 }
 0xc1c   :  { %1462 = vtanh.f32 %v781_v3  ;;  %v1345_v0 = vmul.f32 -1.442695, %v781_v3  ;;  %v1808_v3 = vld [vmem:[%s1872_s3] ss:$0 sm:$0xff] }
 0xc1f   :  { %v709_v59 = vpop.f32.mrf.mxu0 }
 0xc22   :  { %v1463_v60 = vpop.eup %1462 }
 0xc23   :  { %806 = vrot.lane.b32.xlu0 %v1463_v60, %s1525_s2 }
 0xc27   :  { %v852_v32 = vpop.f32.mrf.mxu0 }
 0xc28   :  { %v856_v62 = vadd.f32 %v852_v32, %v108_v61 }
 0xc2a   :  { %1464 = vtanh.f32 %v856_v62  ;;  %v1348_v6 = vmul.f32 -1.442695, %v856_v62 }
 0xc2b   :  { %1466 = vpow2.f32 %v1345_v0 }
 0xc2f   :  { %v854_v37 = vpop.f32.mrf.mxu0 }
 0xc30   :  { %v1465_v63 = vpop.eup %1464 }
 0xc31   :  { %879 = vrot.lane.b32.xlu1 %v1465_v63, %s1525_s2  ;;  %v1467_v2 = vpop.eup %1466 }
 0xc32   :  { %v787_v4 = vadd.f32 1.0, %v1467_v2 }
 0xc34   :  { %1468 = vrcp.f32 %v787_v4  ;;  %v799_v14 = vand.u32 2147483648, %v787_v4  ;;  %vm793_vm10 = vweird.f32 %v787_v4  ;;  %v797_v15 = vand.u32 2147483647, %v787_v4 }
 0xc35   :  { %1470 = vpow2.f32 %v1348_v6 }
 0xc36   :  { %v800_v18 = vor.u32 1.1754944e-38, %v799_v14  ;;  %vm798_vm12 = vcmp.eq.f32.partialorder %v797_v15, 8.507059e+37 }
 0xc3a   :  { %v1469_v7 = vpop.eup %1468 }
 0xc3b   :  { %v1471_v8 = vpop.eup %1470  ;;  %v789_v9 = vmul.f32 %v1469_v7, %v787_v4  ;;  %vm794_vm0 = vweird.f32 %v1469_v7 }
 0xc3c   :  { %v860_v10 = vadd.f32 1.0, %v1471_v8  ;;  %vm795_vm11 = vmor %vm793_vm10, %vm794_vm0 }
 0xc3d   :  { %v790_v11 = vsub.f32 1.0, %v789_v9 }
 0xc3e   :  { %1472 = vrcp.f32 %v860_v10  ;;  %v872_v26 = vand.u32 2147483648, %v860_v10  ;;  %vm866_vm14 = vweird.f32 %v860_v10  ;;  %v870_v27 = vand.u32 2147483647, %v860_v10 }
 0xc3f   :  { %v791_v5 = vmul.f32 %v1469_v7, %v790_v11 }
 0xc40   :  { %v873_v35 = vor.u32 1.1754944e-38, %v872_v26  ;;  %vm871_vm1 = vcmp.eq.f32.partialorder %v870_v27, 8.507059e+37 }
 0xc41   :  { %v792_v13 = vadd.f32 %v1469_v7, %v791_v5 }
 0xc43   :  { %v796_v17 = vsel %vm795_vm11, %v1469_v7, %v792_v13 }
 0xc44   :  { %v1473_v12 = vpop.eup %1472  ;;  %v801_v21 = vsel %vm798_vm12, %v800_v18, %v796_v17 }
 0xc45   :  { %v862_v16 = vmul.f32 %v1473_v12, %v860_v10  ;;  %vm867_vm13 = vweird.f32 %v1473_v12  ;;  %v804_v40 = vmul.f32 %v801_v21, %v1760_v46 }
 0xc46   :  { %vm868_vm15 = vmor %vm866_vm14, %vm867_vm13 }
 0xc47   :  { %v863_v19 = vsub.f32 1.0, %v862_v16 }
 0xc49   :  { %v864_v23 = vmul.f32 %v1473_v12, %v863_v19 }
 0xc4b   :  { %v865_v25 = vadd.f32 %v1473_v12, %v864_v23 }
 0xc4d   :  { %v869_v30 = vsel %vm868_vm15, %v1473_v12, %v865_v25 }
 0xc4e   :  { %v874_v36 = vsel %vm871_vm1, %v873_v35, %v869_v30 }
 0xc4f   :  { %v877_v34 = vmul.f32 %v874_v36, %v1755_v42 }
 0xc95   :  { %v807_v20 = vpop.permute.xlu0 %806 }
 0xc96   :  { %v809_v22 = vmul.f32 %v807_v20, %v801_v21 }
 0xc98   :  { %811 = vrot.lane.b32.xlu2 %v809_v22, %s1526_s18 }
 0xca3   :  { %v880_v29 = vpop.permute.xlu1 %879 }
 0xca4   :  { %v882_v39 = vmul.f32 %v880_v29, %v874_v36 }
 0xca6   :  { %884 = vrot.lane.b32.xlu0 %v882_v39, %s1526_s18 }
 0xcf2   :  { %v812_v44 = vpop.permute.xlu2 %811 }
 0xcf3   :  { %v1788_v45 = vadd.f32 %v812_v44, %v804_v40 }
 0xcf5   :  { %1474 = vtanh.f32 %v1788_v45 }
 0xcfb   :  { %v1475_v38 = vpop.eup %1474 }
 0xcfc   :  { %817 = vrot.lane.b32.xlu1 %v1475_v38, %s1525_s2 }
 0xd18   :  { %v885_v28 = vpop.permute.xlu0 %884 }
 0xd19   :  { %v1793_v41 = vadd.f32 %v885_v28, %v877_v34 }
 0xd1b   :  { %1476 = vtanh.f32 %v1793_v41 }
 0xd21   :  { %v1477_v47 = vpop.eup %1476 }
 0xd22   :  { %890 = vrot.lane.b32.xlu2 %v1477_v47, %s1525_s2 }
 0xd6e   :  { %v818_v48 = vpop.permute.xlu1 %817 }
 0xd6f   :  { %v820_v46 = vmul.f32 %v818_v48, %v801_v21 }
 0xd71   :  { %v821_v49 = vpack.c.bf16 %v820_v46, %v820_v46 }
 0xd73   :  { %823 = vrot.lane.b32.xlu0 %v821_v49, %s1526_s18 }
 0xd7c   :  { %v891_v50 = vpop.permute.xlu2 %890 }
 0xd7d   :  { %v893_v24 = vmul.f32 %v891_v50, %v874_v36 }
 0xd7f   :  { %v894_v51 = vpack.c.bf16 %v893_v24, %v893_v24 }
 0xd81   :  { %896 = vrot.lane.b32.xlu1 %v894_v51, %s1526_s18 }
 0xde5   :  { %v824_v52 = vpop.permute.xlu0 %823 }
 0xde6   :  { %1346 = vmatmul.msk.bf16.vlgmr.msra.gmra.mxu3 %vm151_vm5, %v824_v52  ;;  %v1834_v52 = vld [vmem:[%s1875_s6] ss:$0 sm:$0xff] }
 0xde7   :  { %1167 = vmatpush.bf16.msra.mxu3 %v1616_v31  ;;  %v111_v31 = vadd.f32 %v1808_v3, %v1777_v55 }
 0xdeb   :  { %1168 = vmatpush.bf16.msra.mxu3 %v1628_v33 }
 0xdf3   :  { %v897_v42 = vpop.permute.xlu1 %896 }
 0xdf4   :  { %1349 = vmatmul.msk.bf16.vlgmr.msrb.gmra.mxu1 %vm151_vm5, %v897_v42 }
 0xdf6   :  { %1352 = vmatmul.msk.bf16.vlgmr.msrb.gmra.mxu3 %vm151_vm5, %v897_v42 }
 0xe69   :  { %v837_v53 = vpop.f32.mrf.mxu3 }
 0xe6a   :  { %v838_v54 = vadd.f32 %v1659_v43, %v837_v53 }
 0xe71   :  { %v839_v56 = vpop.f32.mrf.mxu3  ;;  %v910_v58 = vpop.f32.mrf.mxu1 }
 0xe72   :  { %v911_v1 = vadd.f32 %v910_v58, %v838_v54  ;;  %v113_v56 = vadd.f32 %v1808_v3, %v1779_v57 }
 0xe74   :  { %1478 = vtanh.f32 %v911_v1  ;;  %v1350_v62 = vmul.f32 -1.442695, %v911_v1 }
 0xe79   :  { %v912_v33 = vpop.f32.mrf.mxu1  ;;  %v982_v59 = vpop.f32.mrf.mxu3 }
 0xe7a   :  { %v1479_v60 = vpop.eup %1478  ;;  %v986_v61 = vadd.f32 %v982_v59, %v111_v31 }
 0xe7b   :  { %936 = vrot.lane.b32.xlu2 %v1479_v60, %s1525_s2 }
 0xe7c   :  { %1480 = vtanh.f32 %v986_v61  ;;  %v1353_v55 = vmul.f32 -1.442695, %v986_v61 }
 0xe7d   :  { %1482 = vpow2.f32 %v1350_v62 }
 0xe81   :  { %v984_v43 = vpop.f32.mrf.mxu3 }
 0xe82   :  { %v1481_v32 = vpop.eup %1480 }
 0xe83   :  { %1009 = vrot.lane.b32.xlu0 %v1481_v32, %s1525_s2  ;;  %v1483_v37 = vpop.eup %1482 }
 0xe84   :  { %v917_v63 = vadd.f32 1.0, %v1483_v37 }
 0xe86   :  { %1484 = vrcp.f32 %v917_v63  ;;  %v929_v8 = vand.u32 2147483648, %v917_v63  ;;  %vm923_vm3 = vweird.f32 %v917_v63  ;;  %v927_v9 = vand.u32 2147483647, %v917_v63 }
 0xe87   :  { %1486 = vpow2.f32 %v1353_v55 }
 0xe88   :  { %v930_v5 = vor.u32 1.1754944e-38, %v929_v8  ;;  %vm928_vm6 = vcmp.eq.f32.partialorder %v927_v9, 8.507059e+37 }
 0xe8c   :  { %v1485_v0 = vpop.eup %1484 }
 0xe8d   :  { %v919_v2 = vmul.f32 %v1485_v0, %v917_v63  ;;  %vm924_vm2 = vweird.f32 %v1485_v0  ;;  %v1487_v10 = vpop.eup %1486 }
 0xe8e   :  { %vm925_vm4 = vmor %vm923_vm3, %vm924_vm2  ;;  %v990_v12 = vadd.f32 1.0, %v1487_v10 }
 0xe8f   :  { %v920_v4 = vsub.f32 1.0, %v919_v2 }
 0xe90   :  { %1488 = vrcp.f32 %v990_v12  ;;  %v1002_v21 = vand.u32 2147483648, %v990_v12  ;;  %vm996_vm8 = vweird.f32 %v990_v12  ;;  %v1000_v22 = vand.u32 2147483647, %v990_v12 }
 0xe91   :  { %v921_v6 = vmul.f32 %v1485_v0, %v920_v4 }
 0xe92   :  { %v1003_v25 = vor.u32 1.1754944e-38, %v1002_v21  ;;  %vm1001_vm0 = vcmp.eq.f32.partialorder %v1000_v22, 8.507059e+37 }
 0xe93   :  { %v922_v7 = vadd.f32 %v1485_v0, %v921_v6 }
 0xe95   :  { %v926_v11 = vsel %vm925_vm4, %v1485_v0, %v922_v7 }
 0xe96   :  { %v931_v14 = vsel %vm928_vm6, %v930_v5, %v926_v11  ;;  %v1489_v16 = vpop.eup %1488 }
 0xe97   :  { %v992_v17 = vmul.f32 %v1489_v16, %v990_v12  ;;  %vm997_vm7 = vweird.f32 %v1489_v16  ;;  %v934_v35 = vmul.f32 %v931_v14, %v1788_v45 }
 0xe98   :  { %vm998_vm9 = vmor %vm996_vm8, %vm997_vm7 }
 0xe99   :  { %v993_v18 = vsub.f32 1.0, %v992_v17 }
 0xe9b   :  { %v994_v19 = vmul.f32 %v1489_v16, %v993_v18 }
 0xe9d   :  { %v995_v20 = vadd.f32 %v1489_v16, %v994_v19 }
 0xe9f   :  { %v999_v23 = vsel %vm998_vm9, %v1489_v16, %v995_v20 }
 0xea0   :  { %v1004_v27 = vsel %vm1001_vm0, %v1003_v25, %v999_v23 }
 0xea1   :  { %v1007_v39 = vmul.f32 %v1004_v27, %v1793_v41 }
 0xed5   :  { %v937_v13 = vpop.permute.xlu2 %936 }
 0xed6   :  { %v939_v15 = vmul.f32 %v937_v13, %v931_v14 }
 0xed8   :  { %941 = vrot.lane.b32.xlu1 %v939_v15, %s1526_s18 }
 0xef5   :  { %v1010_v26 = vpop.permute.xlu0 %1009 }
 0xef6   :  { %v1012_v30 = vmul.f32 %v1010_v26, %v1004_v27 }
 0xef8   :  { %1014 = vrot.lane.b32.xlu2 %v1012_v30, %s1526_s18 }
 0xf4a   :  { %v942_v29 = vpop.permute.xlu1 %941 }
 0xf4b   :  { %v1817_v36 = vadd.f32 %v942_v29, %v934_v35 }
 0xf4d   :  { %1490 = vtanh.f32 %v1817_v36 }
 0xf52   :  { %v1015_v40 = vpop.permute.xlu2 %1014 }
 0xf53   :  { %v1491_v44 = vpop.eup %1490  ;;  %v1821_v38 = vadd.f32 %v1015_v40, %v1007_v39 }
 0xf54   :  { %947 = vrot.lane.b32.xlu0 %v1491_v44, %s1525_s2 }
 0xf55   :  { %1492 = vtanh.f32 %v1821_v38 }
 0xf5b   :  { %v1493_v34 = vpop.eup %1492 }
 0xf5c   :  { %1020 = vrot.lane.b32.xlu1 %v1493_v34, %s1525_s2 }
 0xfc6   :  { %v948_v28 = vpop.permute.xlu0 %947 }
 0xfc7   :  { %v950_v45 = vmul.f32 %v948_v28, %v931_v14 }
 0xfc9   :  { %v951_v47 = vpack.c.bf16 %v950_v45, %v950_v45 }
 0xfcb   :  { %953 = vrot.lane.b32.xlu2 %v951_v47, %s1526_s18 }
 0xfce   :  { %v1021_v48 = vpop.permute.xlu1 %1020 }
 0xfcf   :  { %v1023_v46 = vmul.f32 %v1021_v48, %v1004_v27 }
 0xfd1   :  { %v1024_v49 = vpack.c.bf16 %v1023_v46, %v1023_v46 }
 0xfd3   :  { %1026 = vrot.lane.b32.xlu0 %v1024_v49, %s1526_s18 }
0x1025   :  { %v954_v41 = vpop.permute.xlu2 %953 }
0x1026   :  { %1351 = vmatmul.msk.bf16.vlgmr.msrb.gmra.mxu2 %vm151_vm5, %v954_v41 }
0x1045   :  { %v1027_v50 = vpop.permute.xlu0 %1026 }
0x1046   :  { %1354 = vmatmul.msk.bf16.vlgmr.msrb.gmra.mxu0 %vm151_vm5, %v1027_v50  ;;  %1357 = vmatmul.msk.bf16.vlgmr.msra.gmra.mxu2 %vm151_vm5, %v1027_v50 }
0x10a9   :  { %v967_v24 = vpop.f32.mrf.mxu2 }
0x10aa   :  { %v968_v42 = vadd.f32 %v1834_v52, %v967_v24 }
0x10b1   :  { %v969_v51 = vpop.f32.mrf.mxu2 }
0x10c3   :  { %v1040_v53 = vpop.f32.mrf.mxu0 }
0x10c4   :  { %v1041_v54 = vadd.f32 %v1040_v53, %v968_v42 }
0x10c6   :  { %1494 = vtanh.f32 %v1041_v54  ;;  %v1355_v61 = vmul.f32 -1.442695, %v1041_v54 }
0x10c9   :  { %v1112_v58 = vpop.f32.mrf.mxu2 }
0x10ca   :  { %v1116_v1 = vadd.f32 %v1112_v58, %v113_v56 }
0x10cb   :  { %v1042_v31 = vpop.f32.mrf.mxu0 }
0x10cc   :  { %v1495_v33 = vpop.eup %1494  ;;  %1496 = vtanh.f32 %v1116_v1  ;;  %v1358_v63 = vmul.f32 -1.442695, %v1116_v1 }
0x10cd   :  { %1066 = vrot.lane.b32.xlu2 %v1495_v33, %s1525_s2  ;;  %1498 = vpow2.f32 %v1355_v61 }
0x10d1   :  { %v1114_v59 = vpop.f32.mrf.mxu2 }
0x10d2   :  { %v1497_v60 = vpop.eup %1496 }
0x10d3   :  { %1139 = vrot.lane.b32.xlu1 %v1497_v60, %s1525_s2  ;;  %v1499_v43 = vpop.eup %1498 }
0x10d4   :  { %v1047_v32 = vadd.f32 1.0, %v1499_v43 }
0x10d6   :  { %1500 = vrcp.f32 %v1047_v32  ;;  %v1059_v2 = vand.u32 2147483648, %v1047_v32  ;;  %vm1053_vm11 = vweird.f32 %v1047_v32  ;;  %v1057_v55 = vand.u32 2147483647, %v1047_v32 }
0x10d7   :  { %1502 = vpow2.f32 %v1358_v63 }
0x10d8   :  { %v1060_v8 = vor.u32 1.1754944e-38, %v1059_v2  ;;  %vm1058_vm13 = vcmp.eq.f32.partialorder %v1057_v55, 8.507059e+37  ;;  %v1382_v2 = vld [vmem:[%s1876_s7] sm:$0xff] }
0x10dc   :  { %v1501_v62 = vpop.eup %1500 }
0x10dd   :  { %v1049_v37 = vmul.f32 %v1501_v62, %v1047_v32  ;;  %vm1054_vm10 = vweird.f32 %v1501_v62  ;;  %v1503_v4 = vpop.eup %1502 }
0x10de   :  { %vm1055_vm12 = vmor %vm1053_vm11, %vm1054_vm10  ;;  %v1120_v7 = vadd.f32 1.0, %v1503_v4 }
0x10df   :  { %v1050_v57 = vsub.f32 1.0, %v1049_v37 }
0x10e0   :  { %1504 = vrcp.f32 %v1120_v7  ;;  %v1132_v16 = vand.u32 2147483648, %v1120_v7  ;;  %vm1126_vm15 = vweird.f32 %v1120_v7  ;;  %v1130_v17 = vand.u32 2147483647, %v1120_v7 }
0x10e1   :  { %v1051_v3 = vmul.f32 %v1501_v62, %v1050_v57 }
0x10e2   :  { %v1133_v19 = vor.u32 1.1754944e-38, %v1132_v16  ;;  %vm1131_vm2 = vcmp.eq.f32.partialorder %v1130_v17, 8.507059e+37 }
0x10e3   :  { %v1052_v0 = vadd.f32 %v1501_v62, %v1051_v3 }
0x10e5   :  { %v1056_v6 = vsel %vm1055_vm12, %v1501_v62, %v1052_v0  ;;  %v1383_v0 = vld [vmem:[%s1876_s7 + $0x8] sm:$0xff] }
0x10e6   :  { %v1061_v10 = vsel %vm1058_vm13, %v1060_v8, %v1056_v6  ;;  %v1505_v5 = vpop.eup %1504  ;;  %1244 = vmatpush.bf16.msra.mxu0 %v1383_v0  ;;  %v1389_v8 = vld [vmem:[%s1877_s8] ss:$0 sm:$0xff] }
0x10e7   :  { %v1122_v12 = vmul.f32 %v1505_v5, %v1120_v7  ;;  %vm1127_vm14 = vweird.f32 %v1505_v5  ;;  %v1064_v23 = vmul.f32 %v1061_v10, %v1817_v36 }
0x10e8   :  { %vm1128_vm1 = vmor %vm1126_vm15, %vm1127_vm14 }
0x10e9   :  { %v1123_v13 = vsub.f32 1.0, %v1122_v12 }
0x10ea   :  { %1245 = vmatpush.bf16.msra.mxu0 %v1382_v2 }
0x10eb   :  { %v1124_v14 = vmul.f32 %v1505_v5, %v1123_v13 }
0x10ed   :  { %v1125_v15 = vadd.f32 %v1505_v5, %v1124_v14 }
0x10ef   :  { %v1129_v18 = vsel %vm1128_vm1, %v1505_v5, %v1125_v15 }
0x10f0   :  { %v1134_v21 = vsel %vm1131_vm2, %v1133_v19, %v1129_v18 }
0x10f1   :  { %v1137_v30 = vmul.f32 %v1134_v21, %v1821_v38 }
0x1127   :  { %v1067_v9 = vpop.permute.xlu2 %1066 }
0x1128   :  { %v1069_v11 = vmul.f32 %v1067_v9, %v1061_v10 }
0x112a   :  { %1071 = vrot.lane.b32.xlu1 %v1069_v11, %s1526_s18 }
0x1145   :  { %v1140_v20 = vpop.permute.xlu1 %1139 }
0x1146   :  { %v1142_v22 = vmul.f32 %v1140_v20, %v1134_v21 }
0x1148   :  { %1144 = vrot.lane.b32.xlu0 %v1142_v22, %s1526_s18 }
0x119c   :  { %v1072_v25 = vpop.permute.xlu1 %1071 }
0x119d   :  { %v1074_v26 = vadd.f32 %v1072_v25, %v1064_v23 }
0x119f   :  { %1506 = vtanh.f32 %v1074_v26 }
0x11a5   :  { %v1507_v27 = vpop.eup %1506 }
0x11a6   :  { %1077 = vrot.lane.b32.xlu0 %v1507_v27, %s1525_s2 }
0x11ba   :  { %v1145_v35 = vpop.permute.xlu0 %1144 }
0x11bb   :  { %v1147_v29 = vadd.f32 %v1145_v35, %v1137_v30 }
0x11bd   :  { %1508 = vtanh.f32 %v1147_v29 }
0x11c3   :  { %v1509_v39 = vpop.eup %1508 }
0x11c4   :  { %1150 = vrot.lane.b32.xlu2 %v1509_v39, %s1525_s2 }
0x1218   :  { %v1078_v40 = vpop.permute.xlu0 %1077 }
0x1219   :  { %v1080_v44 = vmul.f32 %v1078_v40, %v1061_v10 }
0x121b   :  { %v1081_v34 = vpack.c.bf16 %v1080_v44, %v1080_v44 }
0x121d   :  { %1083 = vrot.lane.b32.xlu2 %v1081_v34, %s1526_s18 }
0x121e   :  { %v1151_v36 = vpop.permute.xlu2 %1150 }
0x121f   :  { %v1153_v28 = vmul.f32 %v1151_v36, %v1134_v21 }
0x1221   :  { %v1154_v45 = vpack.c.bf16 %v1153_v28, %v1153_v28 }
0x1223   :  { %1156 = vrot.lane.b32.xlu1 %v1154_v45, %s1526_s18 }
0x1277   :  { %v1084_v47 = vpop.permute.xlu2 %1083 }
0x1278   :  { %1356 = vmatmul.msk.bf16.vlgmr.msra.gmra.mxu1 %vm151_vm5, %v1084_v47 }
0x1295   :  { %v1157_v38 = vpop.permute.xlu1 %1156 }
0x1296   :  { %1359 = vmatmul.msk.bf16.vlgmr.msra.gmra.mxu3 %vm151_vm5, %v1157_v38 }
0x12f5   :  { %v1097_v48 = vpop.f32.mrf.mxu1 }
0x12f6   :  { %v1098_v49 = vadd.f32 %v1834_v52, %v1097_v48 }
0x12fd   :  { %v1099_v46 = vpop.f32.mrf.mxu1 }
0x1319   :  { %v1170_v41 = vpop.f32.mrf.mxu3 }
0x131a   :  { %v1171_v50 = vadd.f32 %v1170_v41, %v1098_v49 }
0x131c   :  { %1510 = vtanh.f32 %v1171_v50  ;;  %v1360_v42 = vmul.f32 -1.442695, %v1171_v50 }
0x131e   :  { %1512 = vpow2.f32 %v1360_v42 }
0x1321   :  { %v1172_v24 = vpop.f32.mrf.mxu3 }
0x1322   :  { %v1511_v51 = vpop.eup %1510 }
0x1323   :  { %1196 = vrot.lane.b32.xlu0 %v1511_v51, %s1525_s2 }
0x1324   :  { %v1513_v53 = vpop.eup %1512 }
0x1325   :  { %v1177_v54 = vadd.f32 1.0, %v1513_v53 }
0x1327   :  { %1514 = vrcp.f32 %v1177_v54  ;;  %v1189_v59 = vand.u32 2147483648, %v1177_v54  ;;  %vm1183_vm4 = vweird.f32 %v1177_v54  ;;  %v1187_v52 = vand.u32 2147483647, %v1177_v54 }
0x1329   :  { %v1190_v61 = vor.u32 1.1754944e-38, %v1189_v59  ;;  %vm1188_vm7 = vcmp.eq.f32.partialorder %v1187_v52, 8.507059e+37 }
0x132d   :  { %v1515_v56 = vpop.eup %1514 }
0x132e   :  { %v1179_v58 = vmul.f32 %v1515_v56, %v1177_v54  ;;  %vm1184_vm3 = vweird.f32 %v1515_v56 }
0x132f   :  { %vm1185_vm6 = vmor %vm1183_vm4, %vm1184_vm3 }
0x1330   :  { %v1180_v1 = vsub.f32 1.0, %v1179_v58 }
0x1332   :  { %v1181_v31 = vmul.f32 %v1515_v56, %v1180_v1 }
0x1334   :  { %v1182_v33 = vadd.f32 %v1515_v56, %v1181_v31 }
0x1336   :  { %v1186_v60 = vsel %vm1185_vm6, %v1515_v56, %v1182_v33 }
0x1337   :  { %v1191_v32 = vsel %vm1188_vm7, %v1190_v61, %v1186_v60 }
0x1338   :  { %v1194_v37 = vmul.f32 %v1191_v32, %v1074_v26 }
0x1395   :  { %v1197_v43 = vpop.permute.xlu0 %1196 }
0x1396   :  { %v1199_v62 = vmul.f32 %v1197_v43, %v1191_v32 }
0x1398   :  { %1201 = vrot.lane.b32.xlu1 %v1199_v62, %s1526_s18 }
0x140a   :  { %v1202_v63 = vpop.permute.xlu1 %1201 }
0x140b   :  { %v1204_v57 = vadd.f32 %v1202_v63, %v1194_v37 }
0x140d   :  { %1516 = vtanh.f32 %v1204_v57 }
0x1413   :  { %v1517_v3 = vpop.eup %1516 }
0x1414   :  { %1207 = vrot.lane.b32.xlu2 %v1517_v3, %s1525_s2 }
0x146e   :  { %v1208_v4 = vpop.permute.xlu2 %1207 }
0x146f   :  { %v1210_v55 = vmul.f32 %v1208_v4, %v1191_v32 }
0x1471   :  { %v1211_v6 = vpack.c.bf16 %v1210_v55, %v1210_v55 }
0x1473   :  { %1221 = vrot.lane.b32.xlu0 %v1211_v6, %s1526_s18 }
0x14e5   :  { %v1222_v7 = vpop.permute.xlu0 %1221 }
0x14e6   :  { %1369 = vmatmul.msk.bf16.vlgmr.msra.gmra.mxu0 %vm151_vm5, %v1222_v7 }
0x1563   :  { %v1247_v9 = vpop.f32.mrf.mxu0 }
0x1564   :  { %v1248_v10 = vadd.f32 %v1389_v8, %v1247_v9 }
0x1566   :  { %v1370_v11 = vmul.f32 -1.442695, %v1248_v10 }
0x1568   :  { %1518 = vpow2.f32 %v1370_v11 }
0x156b   :  { %v1249_v5 = vpop.f32.mrf.mxu0 }
0x156e   :  { %v1519_v12 = vpop.eup %1518 }
0x156f   :  { %v1254_v13 = vadd.f32 1.0, %v1519_v12 }
0x1571   :  { %1520 = vrcp.f32 %v1254_v13  ;;  %v1266_v17 = vand.u32 2147483648, %v1254_v13  ;;  %v1264_v19 = vand.u32 2147483647, %v1254_v13  ;;  %vm1260_vm5 = vweird.f32 %v1254_v13 }
0x1573   :  { %v1267_v21 = vor.u32 1.1754944e-38, %v1266_v17  ;;  %vm1265_vm0 = vcmp.eq.f32.partialorder %v1264_v19, 8.507059e+37 }
0x1577   :  { %v1521_v14 = vpop.eup %1520 }
0x1578   :  { %v1256_v15 = vmul.f32 %v1521_v14, %v1254_v13  ;;  %vm1261_vm8 = vweird.f32 %v1521_v14 }
0x1579   :  { %vm1262_vm9 = vmor %vm1260_vm5, %vm1261_vm8 }
0x157a   :  { %v1257_v16 = vsub.f32 1.0, %v1256_v15 }
0x157c   :  { %v1258_v18 = vmul.f32 %v1521_v14, %v1257_v16 }
0x157e   :  { %v1259_v20 = vadd.f32 %v1521_v14, %v1258_v18 }
0x1580   :  { %v1263_v22 = vsel %vm1262_vm9, %v1521_v14, %v1259_v20 }
0x1581   :  { %v1268_v23 = vsel %vm1265_vm0, %v1267_v21, %v1263_v22 }
0x1582   :  { %1270 = vst [vmem:[%s1878_s9] sm:$0xff] %v1268_v23 }

</bundles_post_ra>
